<compile_context>
chip_gen: v7x
topology: tpu7x:2x2x1
jax: 0.10.0
libtpu: 0.0.40
codegen_flags: <defaults>
</compile_context>

<pallas_src>
import functools

import jax
import jax.numpy as jnp
from jax import lax
from jax.experimental import pallas as pl
from jax.experimental.pallas import tpu as pltpu


def _round_up(n, m):
    return (n + m - 1) // m * m


# ---------------------------------------------------------------------------
# Fused kernel: conv1 -> relu -> conv2 -> relu -> fc1 -> relu  (all in VMEM)
# ---------------------------------------------------------------------------
def _make_fused_kernel(B, C2, C2p, C1p, HP, nx, R_pad, N2, offsets):
    def kernel(x4_ref, w1_ref, b1_ref, w2_ref, b2_ref, wf_ref, bf_ref,
               o_ref, y1im_ref):
        # ---- conv1: ONE MXU matmul over all images / lanes (f32) --------
        #   x4_ref: (k*k*C, NL)   w1_ref: (C1p, k*k*C)
        y1 = jnp.dot(w1_ref[...], x4_ref[...],
                     preferred_element_type=jnp.float32)
        y1 = jnp.maximum(y1 + b1_ref[...], 0.0)            # (C1p, NL)

        # ---- im2col for conv2: 4 lane-shifted copies of y1 stacked on the
        #      sublane axis (sublane offsets are multiples of C1p=16).
        for t, off in enumerate(offsets):
            y1im_ref[pl.ds(t * C1p, C1p), :] = y1[:, off:off + N2]

        # ---- conv2: ONE MXU matmul (f32) ---------------------------------
        #   w2_ref: (C2p, k*k*C1p)   y1im_ref: (k*k*C1p, N2)
        y2 = jnp.dot(w2_ref[...], y1im_ref[...],
                     preferred_element_type=jnp.float32)
        y2 = jnp.maximum(y2 + b2_ref[...], 0.0)             # (C2p, N2)

        # ---- fc1 + relu, activations never leave VMEM --------------------
        # Per image: (C2p, R_pad) @ (R_pad, C2*HP) -> (C2p, C2*HP); the
        # valid contribution of channel c lives in lane block [c*HP,(c+1)*HP)
        # of row c (the fc weight is zero everywhere else), so the output
        # row is the sum of the diagonal 128-lane blocks.
        bias = bf_ref[...]                                   # (1, HP) f32
        for b in range(B):                                   # tiny static batch
            lhs = y2[:, b * nx:b * nx + R_pad].astype(jnp.bfloat16)
            m = jnp.dot(lhs, wf_ref[...],
                        preferred_element_type=jnp.float32)  # (C2p, C2*HP)
            row = bias
            for c in range(C2):
                row = row + m[c:c + 1, c * HP:(c + 1) * HP]  # (1, HP)
            o_ref[pl.ds(b, 1), :] = jnp.maximum(row, 0.0)    # lane-dense store

    return kernel


# ---------------------------------------------------------------------------
# One-time weight packing (hoisted out of the per-call path)
# ---------------------------------------------------------------------------
def prepack_params(params, obs_shape):
    """Pack PyTorch-layout weights into the kernel layout.  Call once."""
    w1, b1, w2, b2, wf, bfc = params
    C, H, W = obs_shape
    C1, _, k, _ = w1.shape                       # 3C, C, 2, 2
    C2 = w2.shape[0]                             # 2C
    H2, W2 = H - 2, W - 2
    h_dim = wf.shape[0]
    C1p = _round_up(C1, 8)
    C2p = _round_up(C2, 8)
    HP = _round_up(h_dim, 128)
    R_pad = _round_up(H2 * W, 128)

    # conv1 weight: (C1p, k*k*C); columns ordered (tap=di*k+dj, cin)
    w1cat = jnp.transpose(w1, (0, 2, 3, 1)).reshape(C1, k * k * C)
    w1cat = jnp.pad(w1cat, ((0, C1p - C1), (0, 0))).astype(jnp.float32)
    b1col = jnp.pad(b1.reshape(C1, 1),
                    ((0, C1p - C1), (0, 0))).astype(jnp.float32)

    # conv2 weight: (C2p, k*k*C1p); columns ordered (tap, c1-padded)
    w2t = jnp.transpose(w2, (0, 2, 3, 1))                    # (C2, k, k, C1)
    w2t = jnp.pad(w2t, ((0, C2p - C2), (0, 0), (0, 0), (0, C1p - C1)))
    w2cat = w2t.reshape(C2p, k * k * C1p).astype(jnp.float32)
    b2col = jnp.pad(b2.reshape(C2, 1),
                    ((0, C2p - C2), (0, 0))).astype(jnp.float32)

    # fc1 weight: rows r = i*W + j (kernel's spatial lane index), cols
    # c*HP + n.  Wrapped-j rows, rows >= H2*W and cols >= h_dim are zero,
    # which folds both the PyTorch flatten-order permutation and the
    # garbage-row removal into the weight.  bf16 to halve the weight DMA.
    wf4 = wf.reshape(h_dim, C2, H2, W2)
    wfp = jnp.transpose(wf4, (2, 3, 1, 0))                   # (H2, W2, C2, h)
    wfp = jnp.pad(wfp, ((0, 0), (0, W - W2), (0, 0), (0, HP - h_dim)))
    wfp = wfp.reshape(H2 * W, C2 * HP)
    wfp = jnp.pad(wfp, ((0, R_pad - H2 * W), (0, 0))).astype(jnp.bfloat16)

    bf_row = jnp.pad(bfc.reshape(1, h_dim),
                     ((0, 0), (0, HP - h_dim))).astype(jnp.float32)

    return (w1cat, b1col, w2cat, b2col, wfp, bf_row)


# ---------------------------------------------------------------------------
# Forward pass: input prep (one small XLA fusion) + ONE pallas_call + slice
# ---------------------------------------------------------------------------
@functools.partial(jax.jit, static_argnames=("h_dim",))
def cnn_base_old_forward(x, packed, *, h_dim):
    """x: (B, C, H, W) f32 NCHW (PyTorch layout); returns (B, h_dim) f32."""
    w1cat, b1col, w2cat, b2col, wfp, bf_row = packed
    B, C, H, W = x.shape
    k = 2
    C1p = w1cat.shape[0]
    C2p = w2cat.shape[0]
    HP = bf_row.shape[1]
    R_pad = wfp.shape[0]
    C2 = wfp.shape[1] // HP
    offsets = tuple(di * W + dj for di in range(k) for dj in range(k))
    off_max = offsets[-1]                                  # W + 1

    nx = _round_up(max(H * W, R_pad), 128)     # per-image lane stride (aligned)
    N2 = _round_up((B - 1) * nx + R_pad, 128)  # conv2 lanes computed
    NL = _round_up(N2 + off_max, 128)          # conv1 / x4 lanes computed

    # NCHW -> (cin, lanes) with lanes = b*nx + i*W + j, zero-padded between
    # images, then 4-tap im2col stacked on the sublane axis -> (k*k*C, NL).
    xg = jnp.transpose(x, (1, 0, 2, 3)).reshape(C, B, H * W)
    xg = jnp.pad(xg, ((0, 0), (0, 0), (0, nx - H * W))).reshape(C, B * nx)
    tail = max(0, NL + off_max - B * nx)
    xg = jnp.pad(xg, ((0, 0), (0, tail)))
    x4 = jnp.concatenate([xg[:, off:off + NL] for off in offsets],
                         axis=0).astype(jnp.float32)

    flops = 2 * (C1p * (k * k * C) * NL
                 + C2p * (k * k * C1p) * N2
                 + B * C2p * R_pad * C2 * HP)
    bytes_accessed = (x4.size * 4 + w1cat.size * 4 + w2cat.size * 4
                      + wfp.size * 2
                      + (b1col.size + b2col.size + bf_row.size) * 4
                      + B * HP * 4)

    out = pl.pallas_call(
        _make_fused_kernel(B, C2, C2p, C1p, HP, nx, R_pad, N2, offsets),
        out_shape=jax.ShapeDtypeStruct((B, HP), jnp.float32),
        in_specs=[pl.BlockSpec(memory_space=pltpu.MemorySpace.VMEM)] * 7,
        out_specs=pl.BlockSpec(memory_space=pltpu.MemorySpace.VMEM),
        scratch_shapes=[pltpu.VMEM((k * k * C1p, N2), jnp.float32)],
        cost_estimate=pl.CostEstimate(flops=flops, transcendentals=0,
                                      bytes_accessed=bytes_accessed),
    )(x4, w1cat, b1col, w2cat, b2col, wfp, bf_row)

    return out[:, :h_dim]


# ---------------------------------------------------------------------------
# Plain-JAX reference (f32 convs, bf16-operand fc like the kernel)
# ---------------------------------------------------------------------------
def reference_forward(x, params):
    w1, b1, w2, b2, wf, bfc = params
    dn = ("NCHW", "OIHW", "NCHW")
    y = lax.conv_general_dilated(x, w1, (1, 1), "VALID", dimension_numbers=dn)
    y = jnp.maximum(y + b1[None, :, None, None], 0.0)
    y = lax.conv_general_dilated(y, w2, (1, 1), "VALID", dimension_numbers=dn)
    y = jnp.maximum(y + b2[None, :, None, None], 0.0)
    y = y.reshape(x.shape[0], -1)
    y = jnp.dot(y.astype(jnp.bfloat16), wf.T.astype(jnp.bfloat16),
                preferred_element_type=jnp.float32) + bfc
    return jnp.maximum(y, 0.0)


if __name__ == "__main__":
    key = jax.random.PRNGKey(0)
    kx, k1, k2, k3, k4, k5, k6 = jax.random.split(key, 7)

    # observation_space.shape = (4, 16, 16); h_dim = 120 (module defaults)
    B, C, H, W = 2, 4, 16, 16
    h_dim = 120
    C1, C2 = 3 * C, 2 * C
    flat_dim = C2 * (H - 2) * (W - 2)          # 8 * 14 * 14 = 1568

    x = jax.random.normal(kx, (B, C, H, W), jnp.float32)

    # torch default init: U(-1/sqrt(fan_in), 1/sqrt(fan_in))
    bw1 = 1.0 / (C * 2 * 2) ** 0.5
    w1 = jax.random.uniform(k1, (C1, C, 2, 2), jnp.float32, -bw1, bw1)
    b1 = jax.random.uniform(k2, (C1,), jnp.float32, -bw1, bw1)
    bw2 = 1.0 / (C1 * 2 * 2) ** 0.5
    w2 = jax.random.uniform(k3, (C2, C1, 2, 2), jnp.float32, -bw2, bw2)
    b2 = jax.random.uniform(k4, (C2,), jnp.float32, -bw2, bw2)
    bwf = 1.0 / flat_dim ** 0.5
    wf = jax.random.uniform(k5, (h_dim, flat_dim), jnp.float32, -bwf, bwf)
    bfc = jax.random.uniform(k6, (h_dim,), jnp.float32, -bwf, bwf)

    params = (w1, b1, w2, b2, wf, bfc)

    # Weight packing is done ONCE, outside the per-call path.
    packed = jax.block_until_ready(prepack_params(params, (C, H, W)))

    y = cnn_base_old_forward(x, packed, h_dim=h_dim)
    y = jax.block_until_ready(y)

    ref = reference_forward(x, params)
    assert y.shape == (B, h_dim)
    max_err = float(jnp.max(jnp.abs(y - ref)))
    assert jnp.allclose(y, ref, atol=2e-2, rtol=2e-2), max_err

    print("KERNEL_OK")
</pallas_src>

<mosaic_0001>
module attributes {stable_mosaic.version = 11 : i64} {
  func.func @kernel(%arg0: memref<16x640xf32, #tpu.memory_space<vmem>>, %arg1: memref<16x16xf32, #tpu.memory_space<vmem>>, %arg2: memref<16x1xf32, #tpu.memory_space<vmem>>, %arg3: memref<8x64xf32, #tpu.memory_space<vmem>>, %arg4: memref<8x1xf32, #tpu.memory_space<vmem>>, %arg5: memref<256x1024xbf16, #tpu.memory_space<vmem>>, %arg6: memref<1x128xf32, #tpu.memory_space<vmem>>, %arg7: memref<2x128xf32, #tpu.memory_space<vmem>>, %arg8: memref<64x512xf32, #tpu.memory_space<vmem>>) attributes {dimension_semantics = [], scalar_prefetch = 0 : i64, scratch_operands = 1 : i64, tpu.core_type = #tpu.core_type<tc>} {
    %c0 = arith.constant 0 : index
    %c0_0 = arith.constant 0 : index
    %0 = vector.load %arg1[%c0, %c0_0] : memref<16x16xf32, #tpu.memory_space<vmem>>, vector<16x16xf32>
    %c0_1 = arith.constant 0 : index
    %c0_2 = arith.constant 0 : index
    %1 = vector.load %arg0[%c0_1, %c0_2] : memref<16x640xf32, #tpu.memory_space<vmem>>, vector<16x640xf32>
    %cst = arith.constant dense<0.000000e+00> : vector<16x640xf32>
    %2 = tpu.matmul %0, %1, %cst {dimension_numbers = #tpu.dot_dimension_numbers<[1], [0], [0], [1], [0, 0, 1, 1], [], []>} : vector<16x16xf32>, vector<16x640xf32>, vector<16x640xf32> -> vector<16x640xf32>
    %c0_3 = arith.constant 0 : index
    %c0_4 = arith.constant 0 : index
    %3 = vector.load %arg2[%c0_3, %c0_4] : memref<16x1xf32, #tpu.memory_space<vmem>>, vector<16x1xf32>
    %4 = vector.broadcast %3 : vector<16x1xf32> to vector<16x640xf32>
    %5 = arith.addf %2, %4 : vector<16x640xf32>
    %cst_5 = arith.constant 0.000000e+00 : f32
    %6 = vector.broadcast %cst_5 : f32 to vector<16x640xf32>
    %7 = arith.maximumf %5, %6 : vector<16x640xf32>
    %8 = vector.extract_strided_slice %7 {offsets = [0, 0], sizes = [16, 512], strides = [1, 1]} : vector<16x640xf32> to vector<16x512xf32>
    %c0_6 = arith.constant 0 : index
    %c0_7 = arith.constant 0 : index
    %9 = vector.load %arg8[%c0_6, %c0_7] : memref<64x512xf32, #tpu.memory_space<vmem>>, vector<16x512xf32>
    tpu.vector_store %arg8[%c0_6, %c0_7], %8 {strides = array<i32>} : memref<64x512xf32, #tpu.memory_space<vmem>>, vector<16x512xf32>,
    %10 = vector.extract_strided_slice %7 {offsets = [0, 1], sizes = [16, 512], strides = [1, 1]} : vector<16x640xf32> to vector<16x512xf32>
    %c16 = arith.constant 16 : index
    %c0_8 = arith.constant 0 : index
    %11 = vector.load %arg8[%c16, %c0_8] : memref<64x512xf32, #tpu.memory_space<vmem>>, vector<16x512xf32>
    tpu.vector_store %arg8[%c16, %c0_8], %10 {strides = array<i32>} : memref<64x512xf32, #tpu.memory_space<vmem>>, vector<16x512xf32>,
    %12 = vector.extract_strided_slice %7 {offsets = [0, 16], sizes = [16, 512], strides = [1, 1]} : vector<16x640xf32> to vector<16x512xf32>
    %c32 = arith.constant 32 : index
    %c0_9 = arith.constant 0 : index
    %13 = vector.load %arg8[%c32, %c0_9] : memref<64x512xf32, #tpu.memory_space<vmem>>, vector<16x512xf32>
    tpu.vector_store %arg8[%c32, %c0_9], %12 {strides = array<i32>} : memref<64x512xf32, #tpu.memory_space<vmem>>, vector<16x512xf32>,
    %14 = vector.extract_strided_slice %7 {offsets = [0, 17], sizes = [16, 512], strides = [1, 1]} : vector<16x640xf32> to vector<16x512xf32>
    %c48 = arith.constant 48 : index
    %c0_10 = arith.constant 0 : index
    %15 = vector.load %arg8[%c48, %c0_10] : memref<64x512xf32, #tpu.memory_space<vmem>>, vector<16x512xf32>
    tpu.vector_store %arg8[%c48, %c0_10], %14 {strides = array<i32>} : memref<64x512xf32, #tpu.memory_space<vmem>>, vector<16x512xf32>,
    %c0_11 = arith.constant 0 : index
    %c0_12 = arith.constant 0 : index
    %16 = vector.load %arg3[%c0_11, %c0_12] : memref<8x64xf32, #tpu.memory_space<vmem>>, vector<8x64xf32>
    %c0_13 = arith.constant 0 : index
    %c0_14 = arith.constant 0 : index
    %17 = vector.load %arg8[%c0_13, %c0_14] : memref<64x512xf32, #tpu.memory_space<vmem>>, vector<64x512xf32>
    %cst_15 = arith.constant dense<0.000000e+00> : vector<8x512xf32>
    %18 = tpu.matmul %16, %17, %cst_15 {dimension_numbers = #tpu.dot_dimension_numbers<[1], [0], [0], [1], [0, 0, 1, 1], [], []>} : vector<8x64xf32>, vector<64x512xf32>, vector<8x512xf32> -> vector<8x512xf32>
    %c0_16 = arith.constant 0 : index
    %c0_17 = arith.constant 0 : index
    %19 = vector.load %arg4[%c0_16, %c0_17] : memref<8x1xf32, #tpu.memory_space<vmem>>, vector<8x1xf32>
    %20 = vector.broadcast %19 : vector<8x1xf32> to vector<8x512xf32>
    %21 = arith.addf %18, %20 : vector<8x512xf32>
    %cst_18 = arith.constant 0.000000e+00 : f32
    %22 = vector.broadcast %cst_18 : f32 to vector<8x512xf32>
    %23 = arith.maximumf %21, %22 : vector<8x512xf32>
    %c0_19 = arith.constant 0 : index
    %c0_20 = arith.constant 0 : index
    %24 = vector.load %arg6[%c0_19, %c0_20] : memref<1x128xf32, #tpu.memory_space<vmem>>, vector<1x128xf32>
    %25 = vector.extract_strided_slice %23 {offsets = [0, 0], sizes = [8, 256], strides = [1, 1]} : vector<8x512xf32> to vector<8x256xf32>
    %26 = arith.truncf %25 : vector<8x256xf32> to vector<8x256xbf16>
    %c0_21 = arith.constant 0 : index
    %c0_22 = arith.constant 0 : index
    %27 = vector.load %arg5[%c0_21, %c0_22] : memref<256x1024xbf16, #tpu.memory_space<vmem>>, vector<256x1024xbf16>
    %cst_23 = arith.constant dense<0.000000e+00> : vector<8x1024xf32>
    %28 = tpu.matmul %26, %27, %cst_23 {dimension_numbers = #tpu.dot_dimension_numbers<[1], [0], [0], [1], [0, 0, 1, 1], [], []>} : vector<8x256xbf16>, vector<256x1024xbf16>, vector<8x1024xf32> -> vector<8x1024xf32>
    %29 = vector.extract_strided_slice %28 {offsets = [0, 0], sizes = [1, 128], strides = [1, 1]} : vector<8x1024xf32> to vector<1x128xf32>
    %30 = arith.addf %24, %29 : vector<1x128xf32>
    %31 = vector.extract_strided_slice %28 {offsets = [1, 128], sizes = [1, 128], strides = [1, 1]} : vector<8x1024xf32> to vector<1x128xf32>
    %32 = arith.addf %30, %31 : vector<1x128xf32>
    %33 = vector.extract_strided_slice %28 {offsets = [2, 256], sizes = [1, 128], strides = [1, 1]} : vector<8x1024xf32> to vector<1x128xf32>
    %34 = arith.addf %32, %33 : vector<1x128xf32>
    %35 = vector.extract_strided_slice %28 {offsets = [3, 384], sizes = [1, 128], strides = [1, 1]} : vector<8x1024xf32> to vector<1x128xf32>
    %36 = arith.addf %34, %35 : vector<1x128xf32>
    %37 = vector.extract_strided_slice %28 {offsets = [4, 512], sizes = [1, 128], strides = [1, 1]} : vector<8x1024xf32> to vector<1x128xf32>
    %38 = arith.addf %36, %37 : vector<1x128xf32>
    %39 = vector.extract_strided_slice %28 {offsets = [5, 640], sizes = [1, 128], strides = [1, 1]} : vector<8x1024xf32> to vector<1x128xf32>
    %40 = arith.addf %38, %39 : vector<1x128xf32>
    %41 = vector.extract_strided_slice %28 {offsets = [6, 768], sizes = [1, 128], strides = [1, 1]} : vector<8x1024xf32> to vector<1x128xf32>
    %42 = arith.addf %40, %41 : vector<1x128xf32>
    %43 = vector.extract_strided_slice %28 {offsets = [7, 896], sizes = [1, 128], strides = [1, 1]} : vector<8x1024xf32> to vector<1x128xf32>
    %44 = arith.addf %42, %43 : vector<1x128xf32>
    %cst_24 = arith.constant 0.000000e+00 : f32
    %45 = vector.broadcast %cst_24 : f32 to vector<1x128xf32>
    %46 = arith.maximumf %44, %45 : vector<1x128xf32>
    %c0_25 = arith.constant 0 : index
    %c0_26 = arith.constant 0 : index
    %47 = vector.load %arg7[%c0_25, %c0_26] : memref<2x128xf32, #tpu.memory_space<vmem>>, vector<1x128xf32>
    tpu.vector_store %arg7[%c0_25, %c0_26], %46 {strides = array<i32>} : memref<2x128xf32, #tpu.memory_space<vmem>>, vector<1x128xf32>,
    %48 = vector.extract_strided_slice %23 {offsets = [0, 256], sizes = [8, 256], strides = [1, 1]} : vector<8x512xf32> to vector<8x256xf32>
    %49 = arith.truncf %48 : vector<8x256xf32> to vector<8x256xbf16>
    %c0_27 = arith.constant 0 : index
    %c0_28 = arith.constant 0 : index
    %50 = vector.load %arg5[%c0_27, %c0_28] : memref<256x1024xbf16, #tpu.memory_space<vmem>>, vector<256x1024xbf16>
    %cst_29 = arith.constant dense<0.000000e+00> : vector<8x1024xf32>
    %51 = tpu.matmul %49, %50, %cst_29 {dimension_numbers = #tpu.dot_dimension_numbers<[1], [0], [0], [1], [0, 0, 1, 1], [], []>} : vector<8x256xbf16>, vector<256x1024xbf16>, vector<8x1024xf32> -> vector<8x1024xf32>
    %52 = vector.extract_strided_slice %51 {offsets = [0, 0], sizes = [1, 128], strides = [1, 1]} : vector<8x1024xf32> to vector<1x128xf32>
    %53 = arith.addf %24, %52 : vector<1x128xf32>
    %54 = vector.extract_strided_slice %51 {offsets = [1, 128], sizes = [1, 128], strides = [1, 1]} : vector<8x1024xf32> to vector<1x128xf32>
    %55 = arith.addf %53, %54 : vector<1x128xf32>
    %56 = vector.extract_strided_slice %51 {offsets = [2, 256], sizes = [1, 128], strides = [1, 1]} : vector<8x1024xf32> to vector<1x128xf32>
    %57 = arith.addf %55, %56 : vector<1x128xf32>
    %58 = vector.extract_strided_slice %51 {offsets = [3, 384], sizes = [1, 128], strides = [1, 1]} : vector<8x1024xf32> to vector<1x128xf32>
    %59 = arith.addf %57, %58 : vector<1x128xf32>
    %60 = vector.extract_strided_slice %51 {offsets = [4, 512], sizes = [1, 128], strides = [1, 1]} : vector<8x1024xf32> to vector<1x128xf32>
    %61 = arith.addf %59, %60 : vector<1x128xf32>
    %62 = vector.extract_strided_slice %51 {offsets = [5, 640], sizes = [1, 128], strides = [1, 1]} : vector<8x1024xf32> to vector<1x128xf32>
    %63 = arith.addf %61, %62 : vector<1x128xf32>
    %64 = vector.extract_strided_slice %51 {offsets = [6, 768], sizes = [1, 128], strides = [1, 1]} : vector<8x1024xf32> to vector<1x128xf32>
    %65 = arith.addf %63, %64 : vector<1x128xf32>
    %66 = vector.extract_strided_slice %51 {offsets = [7, 896], sizes = [1, 128], strides = [1, 1]} : vector<8x1024xf32> to vector<1x128xf32>
    %67 = arith.addf %65, %66 : vector<1x128xf32>
    %cst_30 = arith.constant 0.000000e+00 : f32
    %68 = vector.broadcast %cst_30 : f32 to vector<1x128xf32>
    %69 = arith.maximumf %67, %68 : vector<1x128xf32>
    %c1 = arith.constant 1 : index
    %c0_31 = arith.constant 0 : index
    %70 = vector.load %arg7[%c1, %c0_31] : memref<2x128xf32, #tpu.memory_space<vmem>>, vector<1x128xf32>
    tpu.vector_store %arg7[%c1, %c0_31], %69 {strides = array<i32>} : memref<2x128xf32, #tpu.memory_space<vmem>>, vector<1x128xf32>,
    return
  }
}

</mosaic_0001>

<bundles_post_ra>
// kernel: cnn_base_old_forward.1
= control target key start
LH: loop header
LB: loop body
LE: loop exit
PB: predicated region body
PF: predicated region fallthrough
CT: control target
= control target key end

     0   :  { %12 = vsyncpa [#allocation4], 0  ;;  %s4033_s0 = inlined_call_operand.vmem [shape: f32[16,640], index: 0, kind: input, shape index: {}]   ;;  %s4034_s1 = inlined_call_operand.vmem [shape: f32[16,16], index: 1, kind: input, shape index: {}]   ;;  %s4035_s2 = inlined_call_operand.vmem [shape: f32[16,1], index: 2, kind: input, shape index: {}]   ;;  %s4036_s3 = inlined_call_operand.vmem [shape: f32[8,64], index: 3, kind: input, shape index: {}]   ;;  %s4037_s4 = inlined_call_operand.vmem [shape: f32[8,1], index: 4, kind: input, shape index: {}]   ;;  %s4038_s5 = inlined_call_operand.hbm [shape: bf16[256,1024], index: 5, kind: input, shape index: {}]   ;;  %s4039_s6 = inlined_call_operand.vmem [shape: f32[1,128], index: 6, kind: input, shape index: {}]   ;;  %s4040_s7 = inlined_call_operand.hbm [shape: f32[2,128], index: 7, kind: output, shape index: {}]  }
   0x1   :  { %13 = vsyncpa [#allocation5], 0  ;;  %s3261_s24 = smov [#allocation3]   ;;  %s3213_s28 = scalar_lea.hbm %s4038_s5, 16384 }
   0x2   :  { %s29_s25 = sshll.u32 %s3261_s24, 4  ;;  %p3214_p0 = scmp.ne.s32.totalorder %s4038_s5, %s3213_s28  ;;  %s30_s25 = int_to_ptr.vmem [resolvable:$true] %s29_s25 }
   0x3   :  { %p3217_p1 = scmp.lt.u32.totalorder %s3213_s28, %s4038_s5 }
   0x5   :  { %p3219_p2 = pnand %p3217_p1, %p3214_p0 }
   0x7   :  { %3222 = shalt.err (!%p3219_p2)
}
   0x8   :  { %s3223_s10 = scalar_lea.vmem %s30_s25, 16384  ;;  %p3228_p4 = scmp.lt.s32.totalorder %s30_s25, %s30_s25 }
   0x9   :  { %p3224_p3 = scmp.ne.s32.totalorder %s30_s25, %s3223_s10  ;;  %p3229_p5 = scmp.lt.s32.totalorder %s3223_s10, %s3223_s10 }
   0xb   :  { %p3230_p6 = por %p3229_p5, %p3228_p4 }
   0xd   :  { %p3231_p7 = pnand %p3230_p6, %p3224_p3 }
   0xf   :  { %3234 = shalt.err (!%p3231_p7)
}
  0x10   :  { %s3262_s11 = smov 512   ;;  %s3263_s12 = smov 32  }
  0x11   :  { %35 = dma.hbm_to_vmem [thread:$0]  %s4038_s5, 16384, %s30_s25, [#allocation4], %s3262_s11, %s3262_s11, %s3263_s12  }
  0x12   :  { %3257 = dma.done.wait [#allocation4], 16384  }
  0x13   :  { %3258 = vsyncadd [#allocation4], 4294950912  ;;  %v3264_v0 = vmov 0.0   ;;  %v3265_v1 = vmov 0   ;;  %v44_v2 = vld [vmem:[%s4033_s0 + $0x8] sm:$0xff]  ;;  %v49_v3 = vld [vmem:[%s4033_s0 + $0x30] sm:$0xff] }
  0x14   :  { %136 = vmatprep.mubr.f32.mxu0 %v3264_v0  ;;  %142 = vmatprep.mubr.f32.mxu1 %v3264_v0  ;;  %v43_v4 = vld [vmem:[%s4033_s0] sm:$0xff]  ;;  %v3080_v5 = vpack.c.bf16 %v49_v3, %v44_v2  ;;  %v48_v6 = vld [vmem:[%s4033_s0 + $0x28] sm:$0xff]  ;;  %v46_v8 = vld [vmem:[%s4033_s0 + $0x18] sm:$0xff]  ;;  %vm65_vm0 = vcmask 130048   ;;  %s3268_s18 = smov 111   ;;  %vm349_vm1 = vcmask 1039360  }
  0x15   :  { %3136 = vset.pattern.permute.xlu0 %v3265_v1  ;;  %3212 = vset.pattern.permute.xlu1 %v3265_v1  ;;  %v3082_v7 = vpack.c.bf16 %v48_v6, %v43_v4  ;;  %v51_v9 = vld [vmem:[%s4033_s0 + $0x40] sm:$0xff]  ;;  %v52_v12 = vld [vmem:[%s4033_s0 + $0x48] sm:$0xff]  ;;  %v45_v13 = vld [vmem:[%s4033_s0 + $0x10] sm:$0xff]  ;;  %vm394_vm2 = vcmask 916480   ;;  %vm439_vm3 = vcmask 908288   ;;  %vm503_vm4 = vcmask 523264  }
  0x16   :  { %v47_v10 = vld [vmem:[%s4033_s0 + $0x20] sm:$0xff]  ;;  %3081 = vmatprep.subr.bf16.mxu0 %v3080_v5  ;;  %3124 = vmatprep.subr.bf16.mxu1 %v3080_v5  ;;  %v3084_v11 = vpack.c.bf16 %v51_v9, %v46_v8  ;;  %v50_v14 = vld [vmem:[%s4033_s0 + $0x38] sm:$0xff]  ;;  %v42_v16 = vld [vmem:[%s4034_s1 + $0x8] sm:$0xff] }
  0x17   :  { %3083 = vmatpush1.bf16.msra.mxu0 %v3082_v7  ;;  %3125 = vmatpush1.bf16.msra.mxu1 %v3082_v7  ;;  %v41_v15 = vld [vmem:[%s4034_s1] sm:$0xff]  ;;  %v3088_v17 = vpack.c.bf16 %v52_v12, %v47_v10  ;;  %v3086_v18 = vpack.c.bf16 %v50_v14, %v45_v13  ;;  %v54_v20 = vld [vmem:[%s4035_s2 + $0x8] sm:$0xff]  ;;  %s3266_s1 = smov 127  }
  0x18   :  { %v53_v19 = vld [vmem:[%s4035_s2] sm:$0xff]  ;;  %3085 = vmatprep.subr.bf16.mxu1 %v3084_v11  ;;  %s3267_s2 = smov 112  }
  0x19   :  { %57 = vperm.xlu0 %3136, %v53_v19   ;;  %3089 = vmatprep.subr.bf16.mxu0 %v3088_v17  ;;  %v497_v62 = vld [vmem:[%s4037_s4] sm:$0xff] }
  0x1a   :  { %2805 = vmatmul.mubr.msk.f32.vlgmr.msra.gmra.mrb[0].mxu0 %vm65_vm0, %v41_v15  ;;  %2806 = vmatmul.mubr.msk.f32.vlgmr.msra.gmra.mrb[0].mxu1 %vm65_vm0, %v42_v16 }
  0x1b   :  { %3087 = vmatpush1.bf16.msra.mxu1 %v3086_v18  ;;  %3091 = vmatpush3.bf16.msra.mxu0 %v3088_v17 }
  0x1c   :  { %213 = vmatprep.mubr.f32.mxu1 %v3264_v0  ;;  %3077 = vmatprep.mubr.msk.f32.mxu0 %vm65_vm0, %v41_v15 }
  0x1d   :  { %62 = vperm.xlu0 %3136, %v54_v20  }
  0x1e   :  { %2807 = vmatmul.mubr.msk.f32.vlgmr.msra.gmra.mrb[2].mxu1 %vm65_vm0, %v41_v15  ;;  %3078 = vmatmul.mubr.msk.f32.vlgmr.msra.gmra.mrb[2].mxu0 %vm65_vm0, %v42_v16 }
  0x1f   :  { %219 = vmatprep.mubr.f32.mxu1 %v3264_v0  ;;  %642 = vmatprep.mubr.f32.mxu0 %v3264_v0 }
  0x22   :  { %2808 = vmatmul.mubr.msk.f32.gmra.mrb[4].mxu1 %vm65_vm0, %v42_v16 }
  0x23   :  { %571 = vmatprep.mubr.f32.mxu1 %v3264_v0 }
  0x98   :  { %v58_v21 = vpop.permute.xlu0 %57 }
  0x9c   :  { %v63_v22 = vpop.permute.xlu0 %62 }
  0xed   :  { %v138_v23 = vpop.f32.mrb[0].mxu0  ;;  %v144_v24 = vpop.f32.mrb[0].mxu1 }
  0xee   :  { %v139_v25 = vadd.f32 %v138_v23, %v58_v21  ;;  %v145_v26 = vadd.f32 %v144_v24, %v63_v22  ;;  %v140_v27 = vpop.f32.mrb[1].mxu0  ;;  %v146_v28 = vpop.f32.mrb[1].mxu1 }
  0xef   :  { %v141_v29 = vadd.f32 %v140_v27, %v58_v21  ;;  %v147_v30 = vadd.f32 %v146_v28, %v63_v22 }
  0xf0   :  { %v301_v31 = vmax.f32 %v139_v25, 0.0  ;;  %v306_v32 = vmax.f32 %v145_v26, 0.0 }
  0xf1   :  { %v302_v33 = vmax.f32 %v141_v29, 0.0  ;;  %v307_v34 = vmax.f32 %v147_v30, 0.0  ;;  %v215_v35 = vpop.f32.mrb[2].mxu1  ;;  %v3079_v36 = vpop.f32.mrb[2].mxu0 }
  0xf2   :  { %v216_v37 = vadd.f32 %v215_v35, %v58_v21  ;;  %v217_v38 = vpop.f32.mrb[3].mxu1  ;;  %v292_v39 = vpop.f32.mrb[3].mxu0  ;;  %v3137_v40 = vpack.i.bf16 %v306_v32, %v301_v31  ;;  %v3094_v41 = vpack.c.bf16 %v306_v32, %v301_v31  ;;  %v298_v46 = vadd.f32 %v3079_v36, %v63_v22 }
  0xf3   :  { %v218_v42 = vadd.f32 %v217_v38, %v58_v21  ;;  %v293_v43 = vadd.f32 %v292_v39, %v58_v21  ;;  %v3092_v44 = vpack.c.bf16 %v307_v34, %v302_v33  ;;  %v656_v39 = vld [vmem:[#allocation3] sm:$0xff] }
  0xf4   :  { %v303_v45 = vmax.f32 %v216_v37, 0.0  ;;  %3138 = vrot.lane.b32.xlu0 %v3137_v40, %s3266_s1  ;;  %v310_v56 = vmax.f32 %v298_v46, 0.0 }
  0xf5   :  { %v304_v47 = vmax.f32 %v218_v42, 0.0  ;;  %v305_v48 = vmax.f32 %v293_v43, 0.0  ;;  %v221_v49 = vpop.f32.mrb[4].mxu1  ;;  %3093 = vmatprep.subr.bf16.mxu1 %v3092_v44 }
  0xf6   :  { %v222_v50 = vadd.f32 %v221_v49, %v63_v22  ;;  %v223_v51 = vpop.f32.mrb[5].mxu1  ;;  %3095 = vmatpush1.bf16.msra.mxu1 %v3094_v41  ;;  %v3142_v52 = vpack.i.bf16 %v303_v45, %v302_v33 }
  0xf7   :  { %v224_v53 = vadd.f32 %v223_v51, %v63_v22  ;;  %v3182_v54 = vpack.i.bf16 %v305_v48, %v304_v47 }
  0xf8   :  { %v308_v55 = vmax.f32 %v222_v50, 0.0  ;;  %3143 = vrot.lane.b32.xlu1 %v3142_v52, %s3266_s1 }
  0xf9   :  { %v309_v57 = vmax.f32 %v224_v53, 0.0 }
  0xfa   :  { %v3162_v58 = vpack.i.bf16 %v308_v55, %v307_v34  ;;  %v3110_v59 = vpack.c.bf16 %v308_v55, %v303_v45 }
  0xfb   :  { %v3108_v60 = vpack.c.bf16 %v309_v57, %v304_v47  ;;  %v3197_v61 = vpack.i.bf16 %v310_v56, %v309_v57  ;;  %v664_v56 = vld [vmem:[#allocation3 + $0x40] sm:$0xff] }
  0xfc   :  { %3148 = vrot.lane.b32.xlu1 %v3142_v52, %s3267_s2  ;;  %3163 = vrot.lane.b32.xlu0 %v3162_v58, %s3267_s2  ;;  %v668_v57 = vld [vmem:[#allocation3 + $0x60] sm:$0xff] }
  0xfd   :  { %3109 = vmatprep.subr.bf16.mxu0 %v3108_v60  ;;  %v3430_v60 = vld [vmem:[%s4036_s3] sm:$0xff] }
  0xfe   :  { %3111 = vmatpush1.bf16.msra.mxu0 %v3110_v59 }
 0x100   :  { %3153 = vrot.lane.b32.xlu1 %v3162_v58, %s3266_s1  ;;  %3168 = vrot.lane.b32.xlu0 %v3142_v52, %s3268_s18 }
 0x104   :  { %3158 = vrot.lane.b32.xlu1 %v3137_v40, %s3267_s2  ;;  %3178 = vrot.lane.b32.xlu0 %v3137_v40, %s3268_s18  ;;  %v660_v40 = vld [vmem:[#allocation3 + $0x20] sm:$0xff] }
 0x105   :  { %v3421_v51 = vcombine.high %v656_v39, %v660_v40 }
 0x108   :  { %3173 = vrot.lane.b32.xlu1 %v3162_v58, %s3268_s18  ;;  %3198 = vrot.lane.b32.xlu0 %v3197_v61, %s3266_s1 }
 0x10c   :  { %3183 = vrot.lane.b32.xlu1 %v3182_v54, %s3266_s1  ;;  %3203 = vrot.lane.b32.xlu0 %v3197_v61, %s3267_s2 }
 0x110   :  { %3188 = vrot.lane.b32.xlu1 %v3182_v54, %s3267_s2  ;;  %3208 = vrot.lane.b32.xlu0 %v3197_v61, %s3268_s18 }
 0x114   :  { %3193 = vrot.lane.b32.xlu1 %v3182_v54, %s3268_s18 }
 0x118   :  { %500 = vperm.xlu1 %3212, %v497_v62  }
 0x166   :  { %v3139_v63 = vpop.permute.xlu0 %3138 }
 0x167   :  { %v3140_v9 = vunpack.i.l.bf16 %v3139_v63  ;;  %v3141_v12 = vunpack.i.h.bf16 %v3139_v63 }
 0x16a   :  { %v3379_v0 = vpop.permute.xlu1 %3143 }
 0x16b   :  { %v3146_v3 = vunpack.i.h.bf16 %v3379_v0  ;;  %v3145_v4 = vunpack.i.l.bf16 %v3379_v0 }
 0x16d   :  { %v350_v15 = vsel %vm349_vm1, %v3140_v9, %v3145_v4  ;;  %v351_v16 = vsel %vm349_vm1, %v3145_v4, %v3146_v3  ;;  %v3434_v9 = vcombine.low %v656_v39, %v660_v40 }
 0x16e   :  { %v3381_v1 = vpop.permute.xlu1 %3148  ;;  %v3383_v2 = vpop.permute.xlu0 %3163 }
 0x16f   :  { %v3151_v5 = vunpack.i.h.bf16 %v3381_v1  ;;  %v3150_v6 = vunpack.i.l.bf16 %v3381_v1  ;;  %v3166_v7 = vunpack.i.h.bf16 %v3383_v2  ;;  %v3165_v8 = vunpack.i.l.bf16 %v3383_v2 }
 0x171   :  { %v396_v19 = vsel %vm394_vm2, %v3150_v6, %v3151_v5  ;;  %v400_v20 = vsel %vm394_vm2, %v3165_v8, %v3166_v7 }
 0x172   :  { %v3154_v10 = vpop.permute.xlu1 %3153  ;;  %v3391_v11 = vpop.permute.xlu0 %3168  ;;  %v3100_v30 = vpack.c.bf16 %v400_v20, %v396_v19 }
 0x173   :  { %v3156_v13 = vunpack.i.h.bf16 %v3154_v10  ;;  %v3155_v14 = vunpack.i.l.bf16 %v3154_v10  ;;  %v3171_v27 = vunpack.i.h.bf16 %v3391_v11  ;;  %v3170_v28 = vunpack.i.l.bf16 %v3391_v11 }
 0x174   :  { %v3437_v10 = vcombine.high %v664_v56, %v668_v57 }
 0x175   :  { %v354_v17 = vsel %vm349_vm1, %v3141_v12, %v3155_v14  ;;  %v355_v18 = vsel %vm349_vm1, %v3155_v14, %v3156_v13  ;;  %v441_v42 = vsel %vm439_vm3, %v3170_v28, %v3171_v27  ;;  %v672_v14 = vld [vmem:[#allocation3 + $0x80] sm:$0xff] }
 0x176   :  { %v3098_v21 = vpack.c.bf16 %v354_v17, %v350_v15  ;;  %v3159_v22 = vpop.permute.xlu1 %3158  ;;  %v3179_v23 = vpop.permute.xlu0 %3178  ;;  %v3096_v24 = vpack.c.bf16 %v355_v18, %v351_v16  ;;  %v676_v15 = vld [vmem:[#allocation3 + $0xa0] sm:$0xff] }
 0x177   :  { %v3161_v25 = vunpack.i.h.bf16 %v3159_v22  ;;  %v3160_v26 = vunpack.i.l.bf16 %v3159_v22  ;;  %v3180_v29 = vunpack.i.l.bf16 %v3179_v23  ;;  %v3181_v36 = vunpack.i.h.bf16 %v3179_v23 }
 0x178   :  { %3097 = vmatprep.subr.bf16.mxu1 %v3096_v24  ;;  %v657_v24 = vld [vmem:[#allocation3 + $0x8] sm:$0xff]  ;;  %v3453_v1 = vcombine.high %v672_v14, %v676_v15 }
 0x179   :  { %v395_v31 = vsel %vm394_vm2, %v3160_v26, %v3150_v6  ;;  %v399_v32 = vsel %vm394_vm2, %v3161_v25, %v3165_v8  ;;  %3099 = vmatpush1.bf16.msra.mxu1 %v3098_v21  ;;  %v440_v41 = vsel %vm439_vm3, %v3180_v29, %v3170_v28  ;;  %v3450_v21 = vcombine.low %v664_v56, %v668_v57  ;;  %v661_v25 = vld [vmem:[#allocation3 + $0x28] sm:$0xff]  ;;  %v684_v26 = vld [vmem:[#allocation3 + $0xe0] sm:$0xff] }
 0x17a   :  { %v3102_v33 = vpack.c.bf16 %v399_v32, %v395_v31  ;;  %v3409_v34 = vpop.permute.xlu1 %3173  ;;  %v3199_v35 = vpop.permute.xlu0 %3198  ;;  %3101 = vmatprep.subr.bf16.mxu1 %v3100_v30  ;;  %v3471_v39 = vcombine.low %v657_v24, %v661_v25 }
 0x17b   :  { %v3176_v37 = vunpack.i.h.bf16 %v3409_v34  ;;  %v3175_v38 = vunpack.i.l.bf16 %v3409_v34  ;;  %v3201_v44 = vunpack.i.h.bf16 %v3199_v35  ;;  %v3200_v45 = vunpack.i.l.bf16 %v3199_v35  ;;  %v665_v34 = vld [vmem:[#allocation3 + $0x48] sm:$0xff] }
 0x17c   :  { %v3463_v35 = vcombine.high %v657_v24, %v661_v25  ;;  %v713_v25 = vld [vmem:[#allocation3 + $0x1c8] sm:$0xff] }
 0x17d   :  { %v444_v43 = vsel %vm439_vm3, %v3181_v36, %v3175_v38  ;;  %3103 = vmatpush1.bf16.msra.mxu1 %v3102_v33  ;;  %v445_v46 = vsel %vm439_vm3, %v3175_v38, %v3176_v37  ;;  %v356_v58 = vsel %vm349_vm1, %v3156_v13, %v3200_v45  ;;  %v357_v62 = vsel %vm349_vm1, %v3200_v45, %v3201_v44  ;;  %v669_v38 = vld [vmem:[#allocation3 + $0x68] sm:$0xff]  ;;  %v696_v45 = vld [vmem:[#allocation3 + $0x140] sm:$0xff] }
 0x17e   :  { %v3106_v47 = vpack.c.bf16 %v444_v43, %v440_v41  ;;  %v3184_v48 = vpop.permute.xlu1 %3183  ;;  %v3204_v49 = vpop.permute.xlu0 %3203  ;;  %v3104_v50 = vpack.c.bf16 %v445_v46, %v441_v42  ;;  %v3466_v36 = vcombine.low %v672_v14, %v676_v15  ;;  %v3474_v40 = vcombine.high %v665_v34, %v669_v38  ;;  %v673_v42 = vld [vmem:[#allocation3 + $0x88] sm:$0xff]  ;;  %v700_v46 = vld [vmem:[#allocation3 + $0x160] sm:$0xff] }
 0x17f   :  { %v3186_v52 = vunpack.i.h.bf16 %v3184_v48  ;;  %v3185_v53 = vunpack.i.l.bf16 %v3184_v48  ;;  %v3206_v54 = vunpack.i.h.bf16 %v3204_v49  ;;  %v3205_v55 = vunpack.i.l.bf16 %v3204_v49  ;;  %v677_v43 = vld [vmem:[#allocation3 + $0xa8] sm:$0xff]  ;;  %v724_v14 = vld [vmem:[#allocation3 + $0x220] sm:$0xff] }
 0x180   :  { %3105 = vmatprep.subr.bf16.mxu1 %v3104_v50  ;;  %v3488_v48 = vcombine.high %v673_v42, %v677_v43  ;;  %v681_v50 = vld [vmem:[#allocation3 + $0xc8] sm:$0xff]  ;;  %v3497_v56 = vcombine.low %v673_v42, %v677_v43 }
 0x181   :  { %v352_v59 = vsel %vm349_vm1, %v3146_v3, %v3185_v53  ;;  %3107 = vmatpush1.bf16.msra.mxu1 %v3106_v47  ;;  %v353_v61 = vsel %vm349_vm1, %v3185_v53, %v3186_v52  ;;  %v401_v12 = vsel %vm394_vm2, %v3166_v7, %v3205_v55  ;;  %v402_v13 = vsel %vm394_vm2, %v3205_v55, %v3206_v54  ;;  %v685_v52 = vld [vmem:[#allocation3 + $0xe8] sm:$0xff]  ;;  %v704_v54 = vld [vmem:[#allocation3 + $0x180] sm:$0xff] }
 0x182   :  { %v3114_v63 = vpack.c.bf16 %v356_v58, %v352_v59  ;;  %v3189_v4 = vpop.permute.xlu1 %3188  ;;  %v3209_v6 = vpop.permute.xlu0 %3208  ;;  %v3112_v8 = vpack.c.bf16 %v357_v62, %v353_v61  ;;  %1424 = vmatprep.subr.bf16.mxu1 %v3421_v51  ;;  %v3485_v47 = vcombine.low %v665_v34, %v669_v38  ;;  %v3494_v53 = vcombine.high %v696_v45, %v700_v46  ;;  %v708_v55 = vld [vmem:[#allocation3 + $0x1a0] sm:$0xff]  ;;  %v689_v59 = vld [vmem:[#allocation3 + $0x108] sm:$0xff] }
 0x183   :  { %v3191_v0 = vunpack.i.h.bf16 %v3189_v4  ;;  %v3190_v3 = vunpack.i.l.bf16 %v3189_v4  ;;  %v3211_v17 = vunpack.i.h.bf16 %v3209_v6  ;;  %v3210_v18 = vunpack.i.l.bf16 %v3209_v6  ;;  %v712_v62 = vld [vmem:[#allocation3 + $0x1c0] sm:$0xff]  ;;  %v725_v34 = vld [vmem:[#allocation3 + $0x228] sm:$0xff] }
 0x184   :  { %2811 = vmatmul.mubr.msk.f32.vlgmr.msra.gmra.mrb[6].mxu1 %vm503_vm4, %v3430_v60  ;;  %3113 = vmatprep.subr.bf16.mxu0 %v3112_v8  ;;  %v3500_v57 = vcombine.high %v681_v50, %v685_v52  ;;  %v3503_v58 = vcombine.low %v696_v45, %v700_v46  ;;  %v3506_v61 = vcombine.high %v704_v54, %v708_v55  ;;  %v729_v46 = vld [vmem:[#allocation3 + $0x248] sm:$0xff] }
 0x185   :  { %v397_v16 = vsel %vm394_vm2, %v3151_v5, %v3190_v3  ;;  %3115 = vmatpush1.bf16.msra.mxu0 %v3114_v63  ;;  %v398_v19 = vsel %vm394_vm2, %v3190_v3, %v3191_v0  ;;  %1425 = vmatpush1.bf16.msra.mxu1 %v3434_v9  ;;  %v680_v5 = vld [vmem:[#allocation3 + $0xc0] sm:$0xff]  ;;  %v446_v28 = vsel %vm439_vm3, %v3176_v37, %v3210_v18  ;;  %v697_v0 = vld [vmem:[#allocation3 + $0x148] sm:$0xff] }
 0x186   :  { %v3118_v2 = vpack.c.bf16 %v401_v12, %v397_v16  ;;  %v3194_v20 = vpop.permute.xlu1 %3193  ;;  %v3116_v7 = vpack.c.bf16 %v402_v13, %v398_v19  ;;  %1426 = vmatprep.subr.bf16.mxu1 %v3437_v10  ;;  %v447_v31 = vsel %vm439_vm3, %v3210_v18, %v3211_v17  ;;  %v3469_v11 = vcombine.high %v680_v5, %v684_v26  ;;  %v692_v37 = vld [vmem:[#allocation3 + $0x120] sm:$0xff]  ;;  %v701_v3 = vld [vmem:[#allocation3 + $0x168] sm:$0xff] }
 0x187   :  { %v3196_v22 = vunpack.i.h.bf16 %v3194_v20  ;;  %v3195_v23 = vunpack.i.l.bf16 %v3194_v20  ;;  %v3477_v41 = vcombine.low %v680_v5, %v684_v26  ;;  %v716_v63 = vld [vmem:[#allocation3 + $0x1e0] sm:$0xff]  ;;  %v3509_v4 = vcombine.low %v681_v50, %v685_v52  ;;  %v705_v18 = vld [vmem:[#allocation3 + $0x188] sm:$0xff] }
 0x188   :  { %3117 = vmatprep.subr.bf16.mxu0 %v3116_v7  ;;  %v3515_v8 = vcombine.low %v704_v54, %v708_v55  ;;  %v3518_v12 = vcombine.high %v712_v62, %v716_v63  ;;  %v720_v13 = vld [vmem:[#allocation3 + $0x200] sm:$0xff]  ;;  %v3524_v16 = vcombine.high %v697_v0, %v701_v3  ;;  %v3527_v17 = vcombine.low %v712_v62, %v716_v63  ;;  %v709_v19 = vld [vmem:[#allocation3 + $0x1a8] sm:$0xff] }
 0x189   :  { %v442_v29 = vsel %vm439_vm3, %v3171_v27, %v3195_v23  ;;  %3119 = vmatpush1.bf16.msra.mxu0 %v3118_v2  ;;  %v443_v30 = vsel %vm439_vm3, %v3195_v23, %v3196_v22  ;;  %1427 = vmatpush1.bf16.msra.mxu1 %v3450_v21  ;;  %v688_v27 = vld [vmem:[#allocation3 + $0x100] sm:$0xff]  ;;  %v3530_v2 = vcombine.high %v720_v13, %v724_v14  ;;  %v717_v5 = vld [vmem:[#allocation3 + $0x1e8] sm:$0xff] }
 0x18a   :  { %v3122_v32 = vpack.c.bf16 %v446_v28, %v442_v29  ;;  %v3120_v33 = vpack.c.bf16 %v447_v31, %v443_v30  ;;  %1428 = vmatprep.subr.bf16.mxu1 %v3453_v1  ;;  %v3480_v44 = vcombine.high %v688_v27, %v692_v37  ;;  %v3491_v49 = vcombine.low %v688_v27, %v692_v37  ;;  %v728_v20 = vld [vmem:[#allocation3 + $0x240] sm:$0xff]  ;;  %v733_v50 = vld [vmem:[#allocation3 + $0x268] sm:$0xff] }
 0x18b   :  { %v732_v7 = vld [vmem:[#allocation3 + $0x260] sm:$0xff]  ;;  %v3533_v22 = vcombine.low %v697_v0, %v701_v3  ;;  %v3536_v23 = vcombine.high %v705_v18, %v709_v19  ;;  %v3539_v24 = vcombine.low %v720_v13, %v724_v14  ;;  %v3545_v30 = vcombine.low %v705_v18, %v709_v19  ;;  %v737_v63 = vld [vmem:[#allocation3 + $0x288] sm:$0xff] }
 0x18c   :  { %3121 = vmatprep.subr.bf16.mxu0 %v3120_v33  ;;  %v3542_v26 = vcombine.high %v728_v20, %v732_v7  ;;  %v736_v28 = vld [vmem:[#allocation3 + $0x280] sm:$0xff]  ;;  %v3548_v31 = vcombine.high %v713_v25, %v717_v5  ;;  %v721_v33 = vld [vmem:[#allocation3 + $0x208] sm:$0xff]  ;;  %v3557_v42 = vcombine.low %v713_v25, %v717_v5  ;;  %v3581_v18 = vcombine.low %v729_v46, %v733_v50 }
 0x18d   :  { %3123 = vmatpush1.bf16.msra.mxu0 %v3122_v32  ;;  %1429 = vmatpush1.bf16.msra.mxu1 %v3466_v36  ;;  %v740_v29 = vld [vmem:[#allocation3 + $0x2a0] sm:$0xff]  ;;  %v3551_v32 = vcombine.low %v728_v20, %v732_v7  ;;  %v3560_v43 = vcombine.high %v721_v33, %v725_v34  ;;  %v741_v0 = vld [vmem:[#allocation3 + $0x2a8] sm:$0xff] }
 0x18e   :  { %1465 = vmatprep.subr.bf16.mxu0 %v3463_v35  ;;  %1430 = vmatprep.subr.bf16.mxu1 %v3469_v11  ;;  %v3554_v38 = vcombine.high %v736_v28, %v740_v29  ;;  %v744_v27 = vld [vmem:[#allocation3 + $0x2c0] sm:$0xff]  ;;  %v3563_v45 = vcombine.low %v736_v28, %v740_v29  ;;  %v3584_v19 = vcombine.high %v737_v63, %v741_v0  ;;  %v745_v7 = vld [vmem:[#allocation3 + $0x2c8] sm:$0xff] }
 0x18f   :  { %v748_v37 = vld [vmem:[#allocation3 + $0x2e0] sm:$0xff]  ;;  %v749_v25 = vld [vmem:[#allocation3 + $0x2e8] sm:$0xff]  ;;  %v3593_v28 = vcombine.low %v737_v63, %v741_v0 }
 0x190   :  { %2812 = vmatmul.mubr.msk.f32.vlgmr.msra.gmra.mrb[4].mxu0 %vm503_vm4, %v3430_v60  ;;  %v693_v60 = vld [vmem:[#allocation3 + $0x128] sm:$0xff]  ;;  %4116 = vst [vmem:[#allocation9_spill] sm:$0xff] %v3563_v45  ;;  %v3566_v52 = vcombine.high %v744_v27, %v748_v37  ;;  %v752_v54 = vld [vmem:[#allocation3 + $0x300] sm:$0xff]  ;;  %v3575_v62 = vcombine.low %v744_v27, %v748_v37  ;;  %4120 = vst [vmem:[#allocation13_spill] sm:$0xff] %v3584_v19  ;;  %v3596_v29 = vcombine.high %v745_v7, %v749_v25 }
 0x191   :  { %1466 = vmatpush1.bf16.msra.mxu0 %v3471_v39  ;;  %1431 = vmatpush1.bf16.msra.mxu1 %v3477_v41  ;;  %v3512_v6 = vcombine.high %v689_v59, %v693_v60  ;;  %v3521_v15 = vcombine.low %v689_v59, %v693_v60  ;;  %v756_v55 = vld [vmem:[#allocation3 + $0x320] sm:$0xff]  ;;  %v3569_v59 = vcombine.low %v721_v33, %v725_v34  ;;  %v753_v34 = vld [vmem:[#allocation3 + $0x308] sm:$0xff] }
 0x192   :  { %1467 = vmatprep.subr.bf16.mxu0 %v3474_v40  ;;  %1432 = vmatprep.subr.bf16.mxu1 %v3480_v44  ;;  %4117 = vst [vmem:[#allocation10_spill] sm:$0xff] %v3566_v52  ;;  %v3572_v60 = vcombine.high %v729_v46, %v733_v50  ;;  %4118 = vst [vmem:[#allocation11_spill] sm:$0xff] %v3575_v62  ;;  %v3578_v3 = vcombine.high %v752_v54, %v756_v55  ;;  %v760_v13 = vld [vmem:[#allocation3 + $0x340] sm:$0xff]  ;;  %v757_v27 = vld [vmem:[#allocation3 + $0x328] sm:$0xff] }
 0x193   :  { %v764_v14 = vld [vmem:[#allocation3 + $0x360] sm:$0xff]  ;;  %v3587_v20 = vcombine.low %v752_v54, %v756_v55  ;;  %4123 = vst [vmem:[#allocation16_spill] sm:$0xff] %v3593_v28  ;;  %4124 = vst [vmem:[#allocation17_spill] sm:$0xff] %v3596_v29  ;;  %v3603_v37 = vcombine.low %v745_v7, %v749_v25  ;;  %v3606_v46 = vcombine.high %v753_v34, %v757_v27  ;;  %v761_v50 = vld [vmem:[#allocation3 + $0x348] sm:$0xff] }
 0x194   :  { %4119 = vst [vmem:[#allocation12_spill] sm:$0xff] %v3578_v3  ;;  %v3590_v5 = vcombine.high %v760_v13, %v764_v14  ;;  %v3599_v33 = vcombine.low %v760_v13, %v764_v14  ;;  %v765_v54 = vld [vmem:[#allocation3 + $0x368] sm:$0xff]  ;;  %v3610_v55 = vcombine.low %v753_v34, %v757_v27  ;;  %v768_v13 = vld [vmem:[#allocation3 + $0x380] sm:$0xff] }
 0x195   :  { %1468 = vmatpush1.bf16.msra.mxu0 %v3485_v47  ;;  %1433 = vmatpush1.bf16.msra.mxu1 %v3491_v49  ;;  %4121 = vst [vmem:[#allocation14_spill] sm:$0xff] %v3587_v20  ;;  %4126 = vst [vmem:[#allocation19_spill] sm:$0xff] %v3603_v37  ;;  %v3613_v63 = vcombine.high %v761_v50, %v765_v54  ;;  %v3616_v0 = vcombine.low %v761_v50, %v765_v54  ;;  %v772_v14 = vld [vmem:[#allocation3 + $0x3a0] sm:$0xff]  ;;  %v769_v7 = vld [vmem:[#allocation3 + $0x388] sm:$0xff] }
 0x196   :  { %1469 = vmatprep.subr.bf16.mxu0 %v3488_v48  ;;  %1434 = vmatprep.subr.bf16.mxu1 %v3494_v53  ;;  %4122 = vst [vmem:[#allocation15_spill] sm:$0xff] %v3590_v5  ;;  %4125 = vst [vmem:[#allocation18_spill] sm:$0xff] %v3599_v33  ;;  %v3620_v25 = vcombine.low %v768_v13, %v772_v14  ;;  %v773_v34 = vld [vmem:[#allocation3 + $0x3a8] sm:$0xff]  ;;  %v776_v50 = vld [vmem:[#allocation3 + $0x3c0] sm:$0xff] }
 0x197   :  { %4127 = vst [vmem:[#allocation20_spill] sm:$0xff] %v3606_v46  ;;  %4128 = vst [vmem:[#allocation21_spill] sm:$0xff] %v3610_v55  ;;  %v3624_v27 = vcombine.low %v769_v7, %v773_v34  ;;  %v780_v54 = vld [vmem:[#allocation3 + $0x3e0] sm:$0xff] }
 0x198   :  { %4129 = vst [vmem:[#allocation22_spill] sm:$0xff] %v3613_v63  ;;  %4130 = vst [vmem:[#allocation23_spill] sm:$0xff] %v3616_v0 }
 0x199   :  { %1470 = vmatpush1.bf16.msra.mxu0 %v3497_v56  ;;  %1435 = vmatpush1.bf16.msra.mxu1 %v3503_v58  ;;  %4131 = vst [vmem:[#allocation24_spill] sm:$0xff] %v3620_v25  ;;  %4133 = vst [vmem:[#allocation26_spill] sm:$0xff] %v3624_v27 }
 0x19a   :  { %1471 = vmatprep.subr.bf16.mxu0 %v3500_v57  ;;  %1436 = vmatprep.subr.bf16.mxu1 %v3506_v61 }
 0x19d   :  { %1472 = vmatpush1.bf16.msra.mxu0 %v3509_v4  ;;  %1437 = vmatpush1.bf16.msra.mxu1 %v3515_v8 }
 0x19e   :  { %1473 = vmatprep.subr.bf16.mxu0 %v3512_v6  ;;  %1438 = vmatprep.subr.bf16.mxu1 %v3518_v12 }
 0x1a1   :  { %1474 = vmatpush1.bf16.msra.mxu0 %v3521_v15  ;;  %1439 = vmatpush1.bf16.msra.mxu1 %v3527_v17 }
 0x1a2   :  { %1475 = vmatprep.subr.bf16.mxu0 %v3524_v16  ;;  %1440 = vmatprep.subr.bf16.mxu1 %v3530_v2 }
 0x1a5   :  { %1476 = vmatpush1.bf16.msra.mxu0 %v3533_v22  ;;  %1441 = vmatpush1.bf16.msra.mxu1 %v3539_v24 }
 0x1a6   :  { %1477 = vmatprep.subr.bf16.mxu0 %v3536_v23  ;;  %1442 = vmatprep.subr.bf16.mxu1 %v3542_v26 }
 0x1a9   :  { %1478 = vmatpush1.bf16.msra.mxu0 %v3545_v30  ;;  %1443 = vmatpush1.bf16.msra.mxu1 %v3551_v32 }
 0x1aa   :  { %1479 = vmatprep.subr.bf16.mxu0 %v3548_v31  ;;  %1444 = vmatprep.subr.bf16.mxu1 %v3554_v38 }
 0x1ad   :  { %1480 = vmatpush1.bf16.msra.mxu0 %v3557_v42  ;;  %1445 = vmatpush1.bf16.msra.mxu1 %v3563_v45  ;;  %v686_v45 = vld [vmem:[#allocation3 + $0xf0] sm:$0xff] }
 0x1ae   :  { %1481 = vmatprep.subr.bf16.mxu0 %v3560_v43  ;;  %1446 = vmatprep.subr.bf16.mxu1 %v3566_v52  ;;  %v679_v52 = vld [vmem:[#allocation3 + $0xb8] sm:$0xff] }
 0x1b1   :  { %1482 = vmatpush1.bf16.msra.mxu0 %v3569_v59  ;;  %1447 = vmatpush1.bf16.msra.mxu1 %v3575_v62 }
 0x1b2   :  { %1483 = vmatprep.subr.bf16.mxu0 %v3572_v60  ;;  %1448 = vmatprep.subr.bf16.mxu1 %v3578_v3  ;;  %v666_v3 = vld [vmem:[#allocation3 + $0x50] sm:$0xff] }
 0x1b5   :  { %1484 = vmatpush1.bf16.msra.mxu0 %v3581_v18  ;;  %1449 = vmatpush1.bf16.msra.mxu1 %v3587_v20 }
 0x1b6   :  { %1485 = vmatprep.subr.bf16.mxu0 %v3584_v19  ;;  %1450 = vmatprep.subr.bf16.mxu1 %v3590_v5  ;;  %v3626_v5 = vcombine.high %v769_v7, %v773_v34  ;;  %v658_v34 = vld [vmem:[#allocation3 + $0x10] sm:$0xff]  ;;  %v687_v19 = vld [vmem:[#allocation3 + $0xf8] sm:$0xff] }
 0x1b8   :  { %4134 = vst [vmem:[#allocation27_spill] sm:$0xff] %v3626_v5 }
 0x1b9   :  { %1486 = vmatpush1.bf16.msra.mxu0 %v3593_v28  ;;  %1451 = vmatpush1.bf16.msra.mxu1 %v3599_v33  ;;  %v3622_v33 = vcombine.high %v768_v13, %v772_v14  ;;  %v781_v13 = vld [vmem:[#allocation3 + $0x3e8] sm:$0xff]  ;;  %v3634_v14 = vcombine.low %v776_v50, %v780_v54 }
 0x1ba   :  { %1487 = vmatprep.subr.bf16.mxu0 %v3596_v29 }
 0x1bb   :  { %4132 = vst [vmem:[#allocation25_spill] sm:$0xff] %v3622_v33  ;;  %1452 = vmatprep.subr.bf16.mxu1 %v3622_v33  ;;  %4136 = vst [vmem:[#allocation29_spill] sm:$0xff] %v3634_v14 }
 0x1bd   :  { %1488 = vmatpush1.bf16.msra.mxu0 %v3603_v37  ;;  %1453 = vmatpush1.bf16.msra.mxu1 %v3620_v25  ;;  %v662_v25 = vld [vmem:[#allocation3 + $0x30] sm:$0xff] }
 0x1be   :  { %1489 = vmatprep.subr.bf16.mxu0 %v3606_v46  ;;  %v3646_v33 = vcombine.high %v658_v34, %v662_v25  ;;  %v670_v37 = vld [vmem:[#allocation3 + $0x70] sm:$0xff] }
 0x1c0   :  { %4140 = vst [vmem:[#allocation33_spill] sm:$0xff] %v3646_v33 }
 0x1c1   :  { %1490 = vmatpush1.bf16.msra.mxu0 %v3610_v55 }
 0x1c2   :  { %1491 = vmatprep.subr.bf16.mxu0 %v3613_v63  ;;  %v3632_v63 = vcombine.high %v776_v50, %v780_v54  ;;  %v663_v50 = vld [vmem:[#allocation3 + $0x38] sm:$0xff] }
 0x1c4   :  { %4135 = vst [vmem:[#allocation28_spill] sm:$0xff] %v3632_v63  ;;  %1454 = vmatprep.subr.bf16.mxu1 %v3632_v63 }
 0x1c5   :  { %1492 = vmatpush1.bf16.msra.mxu0 %v3616_v0  ;;  %v777_v0 = vld [vmem:[#allocation3 + $0x3c8] sm:$0xff]  ;;  %1455 = vmatpush1.bf16.msra.mxu1 %v3634_v14 }
 0x1c6   :  { %1493 = vmatprep.subr.bf16.mxu0 %v3626_v5  ;;  %v3636_v55 = vcombine.low %v777_v0, %v781_v13  ;;  %v3638_v7 = vcombine.high %v777_v0, %v781_v13  ;;  %v659_v5 = vld [vmem:[#allocation3 + $0x18] sm:$0xff]  ;;  %1506 = vmatprep.subr.bf16.mxu1 %v3646_v33  ;;  %v501_v13 = vpop.permute.xlu1 %500  ;;  %v678_v33 = vld [vmem:[#allocation3 + $0xb0] sm:$0xff] }
 0x1c7   :  { %v3648_v54 = vcombine.low %v659_v5, %v663_v50  ;;  %v3650_v0 = vcombine.high %v659_v5, %v663_v50  ;;  %v674_v5 = vld [vmem:[#allocation3 + $0x90] sm:$0xff]  ;;  %v3656_v50 = vcombine.high %v666_v3, %v670_v37 }
 0x1c8   :  { %4137 = vst [vmem:[#allocation30_spill] sm:$0xff] %v3636_v55  ;;  %4138 = vst [vmem:[#allocation31_spill] sm:$0xff] %v3638_v7 }
 0x1c9   :  { %1494 = vmatpush1.bf16.msra.mxu0 %v3624_v27  ;;  %v3644_v27 = vcombine.low %v658_v34, %v662_v25  ;;  %4141 = vst [vmem:[#allocation34_spill] sm:$0xff] %v3648_v54  ;;  %4142 = vst [vmem:[#allocation35_spill] sm:$0xff] %v3650_v0  ;;  %v667_v25 = vld [vmem:[#allocation3 + $0x58] sm:$0xff] }
 0x1ca   :  { %1495 = vmatprep.subr.bf16.mxu0 %v3638_v7  ;;  %v671_v34 = vld [vmem:[#allocation3 + $0x78] sm:$0xff]  ;;  %4143 = vst [vmem:[#allocation36_spill] sm:$0xff] %v3656_v50 }
 0x1cb   :  { %4139 = vst [vmem:[#allocation32_spill] sm:$0xff] %v3644_v27 }
 0x1cd   :  { %1496 = vmatpush1.bf16.msra.mxu0 %v3636_v55 }
 0x1ce   :  { %1547 = vmatprep.subr.bf16.mxu0 %v3650_v0  ;;  %v3658_v0 = vcombine.high %v667_v25, %v671_v34 }
 0x1d0   :  { %4144 = vst [vmem:[#allocation37_spill] sm:$0xff] %v3658_v0 }
 0x257   :  { %v573_v14 = vpop.f32.mrb[6].mxu1 }
 0x258   :  { %v574_v7 = vadd.f32 %v573_v14, %v501_v13  ;;  %v575_v63 = vpop.f32.mrb[7].mxu1  ;;  %v675_v14 = vld [vmem:[#allocation3 + $0x98] sm:$0xff] }
 0x259   :  { %v576_v20 = vadd.f32 %v575_v63, %v501_v13  ;;  %v3670_v63 = vcombine.high %v675_v14, %v679_v52 }
 0x25a   :  { %v649_v46 = vmax.f32 %v574_v7, 0.0  ;;  %v682_v7 = vld [vmem:[#allocation3 + $0xd0] sm:$0xff] }
 0x25b   :  { %v650_v55 = vmax.f32 %v576_v20, 0.0  ;;  %v3664_v20 = vcombine.low %v666_v3, %v670_v37  ;;  %4148 = vst [vmem:[#allocation41_spill] sm:$0xff] %v3670_v63 }
 0x25c   :  { %v3654_v29 = vpack.c.bf16 %v649_v46, %v649_v46  ;;  %v3666_v46 = vcombine.low %v667_v25, %v671_v34  ;;  %v3682_v25 = vcombine.low %v675_v14, %v679_v52  ;;  %v3686_v34 = vcombine.high %v682_v7, %v686_v45 }
 0x25d   :  { %v655_v62 = vpack.c.bf16 %v650_v55, %v650_v55  ;;  %4145 = vst [vmem:[#allocation38_spill] sm:$0xff] %v3664_v20  ;;  %v3668_v55 = vcombine.high %v674_v5, %v678_v33 }
 0x25e   :  { %4146 = vst [vmem:[#allocation39_spill] sm:$0xff] %v3666_v46  ;;  %4150 = vst [vmem:[#allocation43_spill] sm:$0xff] %v3682_v25 }
 0x25f   :  { %1456 = vmatprep.mubr.bf16.mxu1 %v655_v62  ;;  %1497 = vmatprep.mubr.bf16.mxu0 %v655_v62  ;;  %4147 = vst [vmem:[#allocation40_spill] sm:$0xff] %v3668_v55  ;;  %4151 = vst [vmem:[#allocation44_spill] sm:$0xff] %v3686_v34 }
 0x260   :  { %1457 = vmatmul.mubr.bf16.vlgmr.msra.gmra.mrb[8].mxu1 %v3654_v29  ;;  %1498 = vmatmul.mubr.bf16.vlgmr.msra.gmra.mrb[8].mxu0 %v3654_v29 }
 0x261   :  { %1507 = vmatpush1.bf16.msra.mxu1 %v3644_v27  ;;  %1548 = vmatpush1.bf16.msra.mxu0 %v3648_v54  ;;  %v683_v27 = vld [vmem:[#allocation3 + $0xd8] sm:$0xff] }
 0x262   :  { %1538 = vmatprep.mubr.bf16.mxu1 %v655_v62  ;;  %1579 = vmatprep.mubr.bf16.mxu0 %v655_v62  ;;  %v3680_v62 = vcombine.low %v674_v5, %v678_v33  ;;  %v3692_v33 = vcombine.low %v682_v7, %v686_v45  ;;  %v3694_v52 = vcombine.low %v683_v27, %v687_v19 }
 0x263   :  { %v644_v28 = vpop.f32.mrb[4].mxu0  ;;  %1508 = vmatprep.subr.bf16.mxu1 %v3656_v50  ;;  %1549 = vmatprep.subr.bf16.mxu0 %v3658_v0  ;;  %v3688_v0 = vcombine.high %v683_v27, %v687_v19  ;;  %v694_v50 = vld [vmem:[#allocation3 + $0x130] sm:$0xff] }
 0x264   :  { %v3674_v54 = vadd.f32 %v644_v28, %v501_v13  ;;  %v646_v3 = vpop.f32.mrb[5].mxu0  ;;  %4149 = vst [vmem:[#allocation42_spill] sm:$0xff] %v3680_v62  ;;  %v690_v28 = vld [vmem:[#allocation3 + $0x110] sm:$0xff]  ;;  %4153 = vst [vmem:[#allocation46_spill] sm:$0xff] %v3692_v33 }
 0x265   :  { %v3676_v37 = vadd.f32 %v646_v3, %v501_v13  ;;  %1509 = vmatpush1.bf16.msra.mxu1 %v3664_v20  ;;  %1550 = vmatpush1.bf16.msra.mxu0 %v3666_v46  ;;  %4152 = vst [vmem:[#allocation45_spill] sm:$0xff] %v3688_v0  ;;  %v691_v13 = vld [vmem:[#allocation3 + $0x118] sm:$0xff]  ;;  %4154 = vst [vmem:[#allocation47_spill] sm:$0xff] %v3694_v52  ;;  %v3698_v5 = vcombine.high %v690_v28, %v694_v50 }
 0x266   :  { %1510 = vmatprep.subr.bf16.mxu1 %v3668_v55  ;;  %1551 = vmatprep.subr.bf16.mxu0 %v3670_v63  ;;  %v695_v3 = vld [vmem:[#allocation3 + $0x138] sm:$0xff]  ;;  %v698_v63 = vld [vmem:[#allocation3 + $0x150] sm:$0xff]  ;;  %v3704_v45 = vcombine.low %v690_v28, %v694_v50 }
 0x267   :  { %4155 = vst [vmem:[#allocation48_spill] sm:$0xff] %v3698_v5  ;;  %v3700_v14 = vcombine.high %v691_v13, %v695_v3  ;;  %v702_v55 = vld [vmem:[#allocation3 + $0x170] sm:$0xff]  ;;  %v699_v46 = vld [vmem:[#allocation3 + $0x158] sm:$0xff]  ;;  %v3706_v19 = vcombine.low %v691_v13, %v695_v3 }
 0x268   :  { %v703_v20 = vld [vmem:[#allocation3 + $0x178] sm:$0xff]  ;;  %4157 = vst [vmem:[#allocation50_spill] sm:$0xff] %v3704_v45  ;;  %v3710_v27 = vcombine.high %v698_v63, %v702_v55  ;;  %v3716_v50 = vcombine.low %v698_v63, %v702_v55 }
 0x269   :  { %1511 = vmatpush1.bf16.msra.mxu1 %v3680_v62  ;;  %1552 = vmatpush1.bf16.msra.mxu0 %v3682_v25  ;;  %4156 = vst [vmem:[#allocation49_spill] sm:$0xff] %v3700_v14  ;;  %4158 = vst [vmem:[#allocation51_spill] sm:$0xff] %v3706_v19  ;;  %v3712_v7 = vcombine.high %v699_v46, %v703_v20  ;;  %v707_v25 = vld [vmem:[#allocation3 + $0x198] sm:$0xff]  ;;  %v3718_v28 = vcombine.low %v699_v46, %v703_v20 }
 0x26a   :  { %1512 = vmatprep.subr.bf16.mxu1 %v3686_v34  ;;  %1553 = vmatprep.subr.bf16.mxu0 %v3688_v0  ;;  %4159 = vst [vmem:[#allocation52_spill] sm:$0xff] %v3710_v27  ;;  %v706_v0 = vld [vmem:[#allocation3 + $0x190] sm:$0xff]  ;;  %v711_v62 = vld [vmem:[#allocation3 + $0x1b8] sm:$0xff]  ;;  %4161 = vst [vmem:[#allocation54_spill] sm:$0xff] %v3716_v50 }
 0x26b   :  { %4160 = vst [vmem:[#allocation53_spill] sm:$0xff] %v3712_v7  ;;  %v710_v34 = vld [vmem:[#allocation3 + $0x1b0] sm:$0xff]  ;;  %4162 = vst [vmem:[#allocation55_spill] sm:$0xff] %v3718_v28  ;;  %v3724_v3 = vcombine.high %v707_v25, %v711_v62  ;;  %v3730_v20 = vcombine.low %v707_v25, %v711_v62 }
 0x26c   :  { %v3722_v13 = vcombine.high %v706_v0, %v710_v34  ;;  %v3728_v55 = vcombine.low %v706_v0, %v710_v34 }
 0x26d   :  { %1513 = vmatpush1.bf16.msra.mxu1 %v3692_v33  ;;  %1554 = vmatpush1.bf16.msra.mxu0 %v3694_v52  ;;  %4164 = vst [vmem:[#allocation57_spill] sm:$0xff] %v3724_v3  ;;  %v715_v52 = vld [vmem:[#allocation3 + $0x1d8] sm:$0xff]  ;;  %4166 = vst [vmem:[#allocation59_spill] sm:$0xff] %v3730_v20 }
 0x26e   :  { %1514 = vmatprep.subr.bf16.mxu1 %v3698_v5  ;;  %1555 = vmatprep.subr.bf16.mxu0 %v3700_v14  ;;  %4163 = vst [vmem:[#allocation56_spill] sm:$0xff] %v3722_v13  ;;  %v714_v14 = vld [vmem:[#allocation3 + $0x1d0] sm:$0xff]  ;;  %v719_v33 = vld [vmem:[#allocation3 + $0x1f8] sm:$0xff]  ;;  %4165 = vst [vmem:[#allocation58_spill] sm:$0xff] %v3728_v55 }
 0x26f   :  { %v718_v5 = vld [vmem:[#allocation3 + $0x1f0] sm:$0xff]  ;;  %v3736_v63 = vcombine.high %v715_v52, %v719_v33  ;;  %v3742_v62 = vcombine.low %v715_v52, %v719_v33 }
 0x270   :  { %v3734_v46 = vcombine.high %v714_v14, %v718_v5  ;;  %v3740_v0 = vcombine.low %v714_v14, %v718_v5 }
 0x271   :  { %1515 = vmatpush1.bf16.msra.mxu1 %v3704_v45  ;;  %1556 = vmatpush1.bf16.msra.mxu0 %v3706_v19  ;;  %4168 = vst [vmem:[#allocation61_spill] sm:$0xff] %v3736_v63  ;;  %v723_v19 = vld [vmem:[#allocation3 + $0x218] sm:$0xff]  ;;  %4170 = vst [vmem:[#allocation63_spill] sm:$0xff] %v3742_v62 }
 0x272   :  { %1516 = vmatprep.subr.bf16.mxu1 %v3710_v27  ;;  %1557 = vmatprep.subr.bf16.mxu0 %v3712_v7  ;;  %4167 = vst [vmem:[#allocation60_spill] sm:$0xff] %v3734_v46  ;;  %v722_v7 = vld [vmem:[#allocation3 + $0x210] sm:$0xff]  ;;  %v727_v45 = vld [vmem:[#allocation3 + $0x238] sm:$0xff]  ;;  %4169 = vst [vmem:[#allocation62_spill] sm:$0xff] %v3740_v0 }
 0x273   :  { %v726_v27 = vld [vmem:[#allocation3 + $0x230] sm:$0xff]  ;;  %v3748_v34 = vcombine.high %v723_v19, %v727_v45  ;;  %v3754_v33 = vcombine.low %v723_v19, %v727_v45 }
 0x274   :  { %v3746_v25 = vcombine.high %v722_v7, %v726_v27  ;;  %v3752_v5 = vcombine.low %v722_v7, %v726_v27 }
 0x275   :  { %1517 = vmatpush1.bf16.msra.mxu1 %v3716_v50  ;;  %1558 = vmatpush1.bf16.msra.mxu0 %v3718_v28  ;;  %4172 = vst [vmem:[#allocation65_spill] sm:$0xff] %v3748_v34  ;;  %v731_v28 = vld [vmem:[#allocation3 + $0x258] sm:$0xff]  ;;  %4174 = vst [vmem:[#allocation67_spill] sm:$0xff] %v3754_v33 }
 0x276   :  { %1518 = vmatprep.subr.bf16.mxu1 %v3722_v13  ;;  %1559 = vmatprep.subr.bf16.mxu0 %v3724_v3  ;;  %4171 = vst [vmem:[#allocation64_spill] sm:$0xff] %v3746_v25  ;;  %v730_v3 = vld [vmem:[#allocation3 + $0x250] sm:$0xff]  ;;  %v735_v50 = vld [vmem:[#allocation3 + $0x278] sm:$0xff]  ;;  %4173 = vst [vmem:[#allocation66_spill] sm:$0xff] %v3752_v5 }
 0x277   :  { %v734_v13 = vld [vmem:[#allocation3 + $0x270] sm:$0xff]  ;;  %v3760_v14 = vcombine.high %v731_v28, %v735_v50  ;;  %v3766_v45 = vcombine.low %v731_v28, %v735_v50 }
 0x278   :  { %v3758_v52 = vcombine.high %v730_v3, %v734_v13  ;;  %v3764_v27 = vcombine.low %v730_v3, %v734_v13 }
 0x279   :  { %1519 = vmatpush1.bf16.msra.mxu1 %v3728_v55  ;;  %1560 = vmatpush1.bf16.msra.mxu0 %v3730_v20  ;;  %4176 = vst [vmem:[#allocation69_spill] sm:$0xff] %v3760_v14  ;;  %v739_v20 = vld [vmem:[#allocation3 + $0x298] sm:$0xff]  ;;  %4178 = vst [vmem:[#allocation71_spill] sm:$0xff] %v3766_v45 }
 0x27a   :  { %1520 = vmatprep.subr.bf16.mxu1 %v3734_v46  ;;  %1561 = vmatprep.subr.bf16.mxu0 %v3736_v63  ;;  %4175 = vst [vmem:[#allocation68_spill] sm:$0xff] %v3758_v52  ;;  %v738_v63 = vld [vmem:[#allocation3 + $0x290] sm:$0xff]  ;;  %v743_v55 = vld [vmem:[#allocation3 + $0x2b8] sm:$0xff]  ;;  %4177 = vst [vmem:[#allocation70_spill] sm:$0xff] %v3764_v27 }
 0x27b   :  { %v742_v46 = vld [vmem:[#allocation3 + $0x2b0] sm:$0xff]  ;;  %v3772_v7 = vcombine.high %v739_v20, %v743_v55  ;;  %v3778_v50 = vcombine.low %v739_v20, %v743_v55 }
 0x27c   :  { %v3770_v19 = vcombine.high %v738_v63, %v742_v46  ;;  %v3776_v13 = vcombine.low %v738_v63, %v742_v46 }
 0x27d   :  { %1521 = vmatpush1.bf16.msra.mxu1 %v3740_v0  ;;  %1562 = vmatpush1.bf16.msra.mxu0 %v3742_v62  ;;  %4180 = vst [vmem:[#allocation73_spill] sm:$0xff] %v3772_v7  ;;  %v747_v62 = vld [vmem:[#allocation3 + $0x2d8] sm:$0xff]  ;;  %4182 = vst [vmem:[#allocation75_spill] sm:$0xff] %v3778_v50 }
 0x27e   :  { %1522 = vmatprep.subr.bf16.mxu1 %v3746_v25  ;;  %1563 = vmatprep.subr.bf16.mxu0 %v3748_v34  ;;  %4179 = vst [vmem:[#allocation72_spill] sm:$0xff] %v3770_v19  ;;  %v746_v34 = vld [vmem:[#allocation3 + $0x2d0] sm:$0xff]  ;;  %v751_v0 = vld [vmem:[#allocation3 + $0x2f8] sm:$0xff]  ;;  %4181 = vst [vmem:[#allocation74_spill] sm:$0xff] %v3776_v13 }
 0x27f   :  { %v750_v25 = vld [vmem:[#allocation3 + $0x2f0] sm:$0xff]  ;;  %v3784_v3 = vcombine.high %v747_v62, %v751_v0  ;;  %v3790_v55 = vcombine.low %v747_v62, %v751_v0 }
 0x280   :  { %v3782_v28 = vcombine.high %v746_v34, %v750_v25  ;;  %v3788_v46 = vcombine.low %v746_v34, %v750_v25 }
 0x281   :  { %1523 = vmatpush1.bf16.msra.mxu1 %v3752_v5  ;;  %1564 = vmatpush1.bf16.msra.mxu0 %v3754_v33  ;;  %4184 = vst [vmem:[#allocation77_spill] sm:$0xff] %v3784_v3  ;;  %v755_v33 = vld [vmem:[#allocation3 + $0x318] sm:$0xff]  ;;  %4186 = vst [vmem:[#allocation79_spill] sm:$0xff] %v3790_v55 }
 0x282   :  { %1524 = vmatprep.subr.bf16.mxu1 %v3758_v52  ;;  %1565 = vmatprep.subr.bf16.mxu0 %v3760_v14  ;;  %4183 = vst [vmem:[#allocation76_spill] sm:$0xff] %v3782_v28  ;;  %v754_v14 = vld [vmem:[#allocation3 + $0x310] sm:$0xff]  ;;  %v759_v5 = vld [vmem:[#allocation3 + $0x338] sm:$0xff]  ;;  %4185 = vst [vmem:[#allocation78_spill] sm:$0xff] %v3788_v46 }
 0x283   :  { %v758_v52 = vld [vmem:[#allocation3 + $0x330] sm:$0xff]  ;;  %v3796_v63 = vcombine.high %v755_v33, %v759_v5  ;;  %v3802_v0 = vcombine.low %v755_v33, %v759_v5 }
 0x284   :  { %v3794_v20 = vcombine.high %v754_v14, %v758_v52  ;;  %v3800_v25 = vcombine.low %v754_v14, %v758_v52 }
 0x285   :  { %1525 = vmatpush1.bf16.msra.mxu1 %v3764_v27  ;;  %1566 = vmatpush1.bf16.msra.mxu0 %v3766_v45  ;;  %4188 = vst [vmem:[#allocation81_spill] sm:$0xff] %v3796_v63  ;;  %v763_v45 = vld [vmem:[#allocation3 + $0x358] sm:$0xff] }
 0x286   :  { %1526 = vmatprep.subr.bf16.mxu1 %v3770_v19  ;;  %1567 = vmatprep.subr.bf16.mxu0 %v3772_v7  ;;  %4187 = vst [vmem:[#allocation80_spill] sm:$0xff] %v3794_v20  ;;  %v762_v7 = vld [vmem:[#allocation3 + $0x350] sm:$0xff]  ;;  %v767_v27 = vld [vmem:[#allocation3 + $0x378] sm:$0xff] }
 0x287   :  { %v766_v19 = vld [vmem:[#allocation3 + $0x370] sm:$0xff]  ;;  %v3808_v34 = vcombine.high %v763_v45, %v767_v27  ;;  %v3814_v5 = vcombine.low %v763_v45, %v767_v27 }
 0x288   :  { %v3806_v62 = vcombine.high %v762_v7, %v766_v19  ;;  %v3812_v52 = vcombine.low %v762_v7, %v766_v19 }
 0x289   :  { %1527 = vmatpush1.bf16.msra.mxu1 %v3776_v13  ;;  %1568 = vmatpush1.bf16.msra.mxu0 %v3778_v50  ;;  %4189 = vst [vmem:[#allocation82_spill] sm:$0xff] %v3808_v34  ;;  %v771_v50 = vld [vmem:[#allocation3 + $0x398] sm:$0xff] }
 0x28a   :  { %1528 = vmatprep.subr.bf16.mxu1 %v3782_v28  ;;  %1569 = vmatprep.subr.bf16.mxu0 %v3784_v3  ;;  %v770_v3 = vld [vmem:[#allocation3 + $0x390] sm:$0xff]  ;;  %v775_v13 = vld [vmem:[#allocation3 + $0x3b8] sm:$0xff]  ;;  %4190 = vst [vmem:[#allocation83_spill] sm:$0xff] %v3812_v52 }
 0x28b   :  { %v774_v28 = vld [vmem:[#allocation3 + $0x3b0] sm:$0xff]  ;;  %v3820_v14 = vcombine.high %v771_v50, %v775_v13  ;;  %v3826_v27 = vcombine.low %v771_v50, %v775_v13  ;;  %v652_v13 = vmax.f32 %v3676_v37, 0.0 }
 0x28c   :  { %v3818_v33 = vcombine.high %v770_v3, %v774_v28  ;;  %v3824_v19 = vcombine.low %v770_v3, %v774_v28  ;;  %v4232_v37 = vld [vmem:[#allocation50_spill] sm:$0xff]  ;;  %v4233_v28 = vld [vmem:[#allocation51_spill] sm:$0xff]  ;;  %v4234_v3 = vld [vmem:[#allocation52_spill] sm:$0xff] }
 0x28d   :  { %1529 = vmatpush1.bf16.msra.mxu1 %v3788_v46  ;;  %1570 = vmatpush1.bf16.msra.mxu0 %v3790_v55  ;;  %v779_v55 = vld [vmem:[#allocation3 + $0x3d8] sm:$0xff]  ;;  %v3847_v50 = vpack.c.bf16 %v652_v13, %v652_v13  ;;  %v4239_v13 = vld [vmem:[#allocation57_spill] sm:$0xff] }
 0x28e   :  { %1530 = vmatprep.subr.bf16.mxu1 %v3794_v20  ;;  %1571 = vmatprep.subr.bf16.mxu0 %v3796_v63  ;;  %v778_v63 = vld [vmem:[#allocation3 + $0x3d0] sm:$0xff]  ;;  %v783_v46 = vld [vmem:[#allocation3 + $0x3f8] sm:$0xff] }
 0x28f   :  { %v782_v20 = vld [vmem:[#allocation3 + $0x3f0] sm:$0xff]  ;;  %v3832_v7 = vcombine.high %v779_v55, %v783_v46 }
 0x290   :  { %v3830_v45 = vcombine.high %v778_v63, %v782_v20 }
 0x291   :  { %1531 = vmatpush1.bf16.msra.mxu1 %v3800_v25  ;;  %1572 = vmatpush1.bf16.msra.mxu0 %v3802_v0 }
 0x292   :  { %1532 = vmatprep.subr.bf16.mxu1 %v3806_v62  ;;  %1573 = vmatprep.subr.bf16.mxu0 %v3808_v34  ;;  %v3836_v34 = vcombine.low %v778_v63, %v782_v20  ;;  %v4237_v20 = vld [vmem:[#allocation55_spill] sm:$0xff]  ;;  %v4238_v63 = vld [vmem:[#allocation56_spill] sm:$0xff] }
 0x295   :  { %1533 = vmatpush1.bf16.msra.mxu1 %v3812_v52  ;;  %1574 = vmatpush1.bf16.msra.mxu0 %v3814_v5  ;;  %v3838_v52 = vcombine.low %v779_v55, %v783_v46  ;;  %v4235_v46 = vld [vmem:[#allocation53_spill] sm:$0xff]  ;;  %v4236_v55 = vld [vmem:[#allocation54_spill] sm:$0xff] }
 0x296   :  { %1534 = vmatprep.subr.bf16.mxu1 %v3818_v33  ;;  %1575 = vmatprep.subr.bf16.mxu0 %v3820_v14 }
 0x299   :  { %1535 = vmatpush1.bf16.msra.mxu1 %v3824_v19  ;;  %1576 = vmatpush1.bf16.msra.mxu0 %v3826_v27 }
 0x29a   :  { %1536 = vmatprep.subr.bf16.mxu1 %v3830_v45  ;;  %1577 = vmatprep.subr.bf16.mxu0 %v3832_v7 }
 0x29d   :  { %1537 = vmatpush1.bf16.msra.mxu1 %v3836_v34  ;;  %1578 = vmatpush1.bf16.msra.mxu0 %v3838_v52 }
 0x29e   :  { %2492 = vmatprep.subr.bf16.mxu1 %v3421_v51  ;;  %2533 = vmatprep.subr.bf16.mxu0 %v3463_v35  ;;  %v4191_v51 = vld [vmem:[#allocation13_spill] sm:$0xff]  ;;  %v4196_v35 = vld [vmem:[#allocation11_spill] sm:$0xff] }
 0x2a0   :  { %1539 = vmatmul.mubr.bf16.vlgmr.msra.gmra.mrb[12].mxu1 %v3654_v29  ;;  %1580 = vmatmul.mubr.bf16.vlgmr.msra.gmra.mrb[12].mxu0 %v3654_v29  ;;  %v4230_v29 = vld [vmem:[#allocation48_spill] sm:$0xff] }
 0x2a1   :  { %2493 = vmatpush1.bf16.msra.mxu1 %v3434_v9  ;;  %2524 = vmatprep.mubr.bf16.mxu1 %v3847_v50  ;;  %v4192_v9 = vld [vmem:[#allocation9_spill] sm:$0xff] }
 0x2a2   :  { %2534 = vmatpush1.bf16.msra.mxu0 %v3471_v39  ;;  %2565 = vmatprep.mubr.bf16.mxu0 %v3847_v50  ;;  %v4199_v39 = vld [vmem:[#allocation20_spill] sm:$0xff] }
 0x2a3   :  { %2494 = vmatprep.subr.bf16.mxu1 %v3437_v10  ;;  %2535 = vmatprep.subr.bf16.mxu0 %v3474_v40  ;;  %v4193_v10 = vld [vmem:[#allocation16_spill] sm:$0xff]  ;;  %v4200_v40 = vld [vmem:[#allocation14_spill] sm:$0xff] }
 0x2a5   :  { %2495 = vmatpush1.bf16.msra.mxu1 %v3450_v21  ;;  %v4194_v21 = vld [vmem:[#allocation10_spill] sm:$0xff] }
 0x2a6   :  { %2536 = vmatpush1.bf16.msra.mxu0 %v3485_v47  ;;  %2496 = vmatprep.subr.bf16.mxu1 %v3453_v1  ;;  %v4195_v1 = vld [vmem:[#allocation17_spill] sm:$0xff]  ;;  %v4203_v47 = vld [vmem:[#allocation22_spill] sm:$0xff] }
 0x2a7   :  { %2537 = vmatprep.subr.bf16.mxu0 %v3488_v48  ;;  %v4204_v48 = vld [vmem:[#allocation18_spill] sm:$0xff] }
 0x2a9   :  { %2497 = vmatpush1.bf16.msra.mxu1 %v3466_v36  ;;  %v4197_v36 = vld [vmem:[#allocation19_spill] sm:$0xff] }
 0x2aa   :  { %2538 = vmatpush1.bf16.msra.mxu0 %v3497_v56  ;;  %2498 = vmatprep.subr.bf16.mxu1 %v3469_v11  ;;  %v4198_v11 = vld [vmem:[#allocation12_spill] sm:$0xff]  ;;  %v4207_v56 = vld [vmem:[#allocation27_spill] sm:$0xff] }
 0x2ab   :  { %2539 = vmatprep.subr.bf16.mxu0 %v3500_v57  ;;  %v4208_v57 = vld [vmem:[#allocation24_spill] sm:$0xff] }
 0x2ad   :  { %2499 = vmatpush1.bf16.msra.mxu1 %v3477_v41  ;;  %v4201_v41 = vld [vmem:[#allocation21_spill] sm:$0xff] }
 0x2ae   :  { %2540 = vmatpush1.bf16.msra.mxu0 %v3509_v4  ;;  %2500 = vmatprep.subr.bf16.mxu1 %v3480_v44  ;;  %v4202_v44 = vld [vmem:[#allocation15_spill] sm:$0xff]  ;;  %v4210_v4 = vld [vmem:[#allocation28_spill] sm:$0xff] }
 0x2af   :  { %2541 = vmatprep.subr.bf16.mxu0 %v3512_v6  ;;  %v4211_v6 = vld [vmem:[#allocation31_spill] sm:$0xff] }
 0x2b1   :  { %2501 = vmatpush1.bf16.msra.mxu1 %v3491_v49  ;;  %v4205_v49 = vld [vmem:[#allocation23_spill] sm:$0xff] }
 0x2b2   :  { %2542 = vmatpush1.bf16.msra.mxu0 %v3521_v15  ;;  %2502 = vmatprep.subr.bf16.mxu1 %v3494_v53  ;;  %v4206_v53 = vld [vmem:[#allocation25_spill] sm:$0xff]  ;;  %v4213_v15 = vld [vmem:[#allocation30_spill] sm:$0xff] }
 0x2b3   :  { %2543 = vmatprep.subr.bf16.mxu0 %v3524_v16  ;;  %v4214_v16 = vld [vmem:[#allocation33_spill] sm:$0xff] }
 0x2b5   :  { %2503 = vmatpush1.bf16.msra.mxu1 %v3503_v58  ;;  %v651_v58 = vmax.f32 %v3674_v54, 0.0  ;;  %v4231_v54 = vld [vmem:[#allocation49_spill] sm:$0xff] }
 0x2b6   :  { %2544 = vmatpush1.bf16.msra.mxu0 %v3533_v22  ;;  %2504 = vmatprep.subr.bf16.mxu1 %v3506_v61  ;;  %v4209_v61 = vld [vmem:[#allocation26_spill] sm:$0xff] }
 0x2b7   :  { %2545 = vmatprep.subr.bf16.mxu0 %v3536_v23  ;;  %v4217_v22 = vld [vmem:[#allocation34_spill] sm:$0xff]  ;;  %v4218_v23 = vld [vmem:[#allocation36_spill] sm:$0xff] }
 0x2b9   :  { %2505 = vmatpush1.bf16.msra.mxu1 %v3515_v8  ;;  %v4212_v8 = vld [vmem:[#allocation29_spill] sm:$0xff] }
 0x2ba   :  { %2546 = vmatpush1.bf16.msra.mxu0 %v3545_v30  ;;  %2506 = vmatprep.subr.bf16.mxu1 %v3518_v12  ;;  %v3915_v12 = vpack.c.bf16 %v651_v58, %v651_v58  ;;  %v4221_v30 = vld [vmem:[#allocation39_spill] sm:$0xff]  ;;  %v4259_v58 = vld [vmem:[#allocation77_spill] sm:$0xff] }
 0x2bb   :  { %2547 = vmatprep.subr.bf16.mxu0 %v3548_v31  ;;  %v4222_v31 = vld [vmem:[#allocation40_spill] sm:$0xff] }
 0x2bd   :  { %2507 = vmatpush1.bf16.msra.mxu1 %v3527_v17  ;;  %v4215_v17 = vld [vmem:[#allocation35_spill] sm:$0xff] }
 0x2be   :  { %2548 = vmatpush1.bf16.msra.mxu0 %v3557_v42  ;;  %2508 = vmatprep.subr.bf16.mxu1 %v3530_v2  ;;  %v4216_v2 = vld [vmem:[#allocation32_spill] sm:$0xff]  ;;  %v4225_v42 = vld [vmem:[#allocation43_spill] sm:$0xff] }
 0x2bf   :  { %2549 = vmatprep.subr.bf16.mxu0 %v3560_v43  ;;  %v4226_v43 = vld [vmem:[#allocation44_spill] sm:$0xff] }
 0x2c1   :  { %2509 = vmatpush1.bf16.msra.mxu1 %v3539_v24  ;;  %v4219_v24 = vld [vmem:[#allocation37_spill] sm:$0xff] }
 0x2c2   :  { %2550 = vmatpush1.bf16.msra.mxu0 %v3569_v59  ;;  %2510 = vmatprep.subr.bf16.mxu1 %v3542_v26  ;;  %v4220_v26 = vld [vmem:[#allocation38_spill] sm:$0xff]  ;;  %v4227_v59 = vld [vmem:[#allocation45_spill] sm:$0xff] }
 0x2c3   :  { %2551 = vmatprep.subr.bf16.mxu0 %v3572_v60  ;;  %v4228_v60 = vld [vmem:[#allocation46_spill] sm:$0xff] }
 0x2c5   :  { %2511 = vmatpush1.bf16.msra.mxu1 %v3551_v32  ;;  %v4223_v32 = vld [vmem:[#allocation41_spill] sm:$0xff] }
 0x2c6   :  { %2552 = vmatpush1.bf16.msra.mxu0 %v3581_v18  ;;  %2512 = vmatprep.subr.bf16.mxu1 %v3554_v38  ;;  %v4224_v38 = vld [vmem:[#allocation42_spill] sm:$0xff]  ;;  %v4229_v18 = vld [vmem:[#allocation47_spill] sm:$0xff] }
 0x2c7   :  { %2553 = vmatprep.subr.bf16.mxu0 %v4191_v51  ;;  %v4241_v51 = vld [vmem:[#allocation59_spill] sm:$0xff] }
 0x2c9   :  { %2513 = vmatpush1.bf16.msra.mxu1 %v4192_v9  ;;  %v4242_v9 = vld [vmem:[#allocation60_spill] sm:$0xff] }
 0x2ca   :  { %2554 = vmatpush1.bf16.msra.mxu0 %v4193_v10  ;;  %2514 = vmatprep.subr.bf16.mxu1 %v4194_v21  ;;  %v4243_v10 = vld [vmem:[#allocation61_spill] sm:$0xff]  ;;  %v4244_v21 = vld [vmem:[#allocation62_spill] sm:$0xff] }
 0x2cb   :  { %2555 = vmatprep.subr.bf16.mxu0 %v4195_v1  ;;  %v4245_v1 = vld [vmem:[#allocation63_spill] sm:$0xff] }
 0x2cd   :  { %2515 = vmatpush1.bf16.msra.mxu1 %v4196_v35  ;;  %v4246_v35 = vld [vmem:[#allocation64_spill] sm:$0xff] }
 0x2ce   :  { %2556 = vmatpush1.bf16.msra.mxu0 %v4197_v36  ;;  %2516 = vmatprep.subr.bf16.mxu1 %v4198_v11  ;;  %v4247_v36 = vld [vmem:[#allocation65_spill] sm:$0xff]  ;;  %v4248_v11 = vld [vmem:[#allocation66_spill] sm:$0xff] }
 0x2cf   :  { %2557 = vmatprep.subr.bf16.mxu0 %v4199_v39  ;;  %v4249_v39 = vld [vmem:[#allocation67_spill] sm:$0xff] }
 0x2d1   :  { %2517 = vmatpush1.bf16.msra.mxu1 %v4200_v40  ;;  %v4250_v40 = vld [vmem:[#allocation68_spill] sm:$0xff] }
 0x2d2   :  { %2558 = vmatpush1.bf16.msra.mxu0 %v4201_v41  ;;  %2518 = vmatprep.subr.bf16.mxu1 %v4202_v44  ;;  %v4251_v41 = vld [vmem:[#allocation69_spill] sm:$0xff]  ;;  %v4252_v44 = vld [vmem:[#allocation70_spill] sm:$0xff] }
 0x2d3   :  { %2559 = vmatprep.subr.bf16.mxu0 %v4203_v47  ;;  %v4253_v47 = vld [vmem:[#allocation71_spill] sm:$0xff] }
 0x2d5   :  { %2519 = vmatpush1.bf16.msra.mxu1 %v4204_v48  ;;  %v4254_v48 = vld [vmem:[#allocation72_spill] sm:$0xff] }
 0x2d6   :  { %2560 = vmatpush1.bf16.msra.mxu0 %v4205_v49  ;;  %2520 = vmatprep.subr.bf16.mxu1 %v4206_v53  ;;  %v4255_v49 = vld [vmem:[#allocation73_spill] sm:$0xff]  ;;  %v4256_v53 = vld [vmem:[#allocation74_spill] sm:$0xff] }
 0x2d7   :  { %2561 = vmatprep.subr.bf16.mxu0 %v4207_v56  ;;  %v4257_v56 = vld [vmem:[#allocation75_spill] sm:$0xff] }
 0x2d9   :  { %2521 = vmatpush1.bf16.msra.mxu1 %v4208_v57  ;;  %v4258_v57 = vld [vmem:[#allocation76_spill] sm:$0xff] }
 0x2da   :  { %2562 = vmatpush1.bf16.msra.mxu0 %v4209_v61  ;;  %2522 = vmatprep.subr.bf16.mxu1 %v4210_v4  ;;  %v4260_v61 = vld [vmem:[#allocation78_spill] sm:$0xff]  ;;  %v4261_v4 = vld [vmem:[#allocation79_spill] sm:$0xff] }
 0x2db   :  { %2563 = vmatprep.subr.bf16.mxu0 %v4211_v6  ;;  %v4262_v6 = vld [vmem:[#allocation80_spill] sm:$0xff] }
 0x2dd   :  { %2523 = vmatpush1.bf16.msra.mxu1 %v4212_v8  ;;  %v4263_v8 = vld [vmem:[#allocation81_spill] sm:$0xff] }
 0x2de   :  { %2564 = vmatpush1.bf16.msra.mxu0 %v4213_v15  ;;  %2574 = vmatprep.subr.bf16.mxu1 %v4214_v16  ;;  %v4264_v15 = vld [vmem:[#allocation82_spill] sm:$0xff]  ;;  %v4265_v16 = vld [vmem:[#allocation83_spill] sm:$0xff] }
 0x2df   :  { %2615 = vmatprep.subr.bf16.mxu0 %v4215_v17 }
 0x2e0   :  { %2525 = vmatmul.mubr.bf16.vlgmr.msra.gmra.mrb[16].mxu1 %v3915_v12 }
 0x2e1   :  { %2566 = vmatmul.mubr.bf16.vlgmr.msra.gmra.mrb[16].mxu0 %v3915_v12  ;;  %2575 = vmatpush1.bf16.msra.mxu1 %v4216_v2 }
 0x2e2   :  { %2606 = vmatprep.mubr.bf16.mxu1 %v3847_v50  ;;  %2616 = vmatpush1.bf16.msra.mxu0 %v4217_v22 }
 0x2e3   :  { %2647 = vmatprep.mubr.bf16.mxu0 %v3847_v50  ;;  %2576 = vmatprep.subr.bf16.mxu1 %v4218_v23  ;;  %v4240_v50 = vld [vmem:[#allocation58_spill] sm:$0xff] }
 0x2e4   :  { %2617 = vmatprep.subr.bf16.mxu0 %v4219_v24 }
 0x2e5   :  { %2577 = vmatpush1.bf16.msra.mxu1 %v4220_v26 }
 0x2e6   :  { %2618 = vmatpush1.bf16.msra.mxu0 %v4221_v30  ;;  %2578 = vmatprep.subr.bf16.mxu1 %v4222_v31 }
 0x2e7   :  { %2619 = vmatprep.subr.bf16.mxu0 %v4223_v32 }
 0x2e9   :  { %2579 = vmatpush1.bf16.msra.mxu1 %v4224_v38 }
 0x2ea   :  { %2620 = vmatpush1.bf16.msra.mxu0 %v4225_v42  ;;  %2580 = vmatprep.subr.bf16.mxu1 %v4226_v43 }
 0x2eb   :  { %2621 = vmatprep.subr.bf16.mxu0 %v4227_v59 }
 0x2ed   :  { %2581 = vmatpush1.bf16.msra.mxu1 %v4228_v60 }
 0x2ee   :  { %2622 = vmatpush1.bf16.msra.mxu0 %v4229_v18  ;;  %2582 = vmatprep.subr.bf16.mxu1 %v4230_v29 }
 0x2ef   :  { %2623 = vmatprep.subr.bf16.mxu0 %v4231_v54 }
 0x2f1   :  { %2583 = vmatpush1.bf16.msra.mxu1 %v4232_v37 }
 0x2f2   :  { %2624 = vmatpush1.bf16.msra.mxu0 %v4233_v28  ;;  %2584 = vmatprep.subr.bf16.mxu1 %v4234_v3 }
 0x2f3   :  { %2625 = vmatprep.subr.bf16.mxu0 %v4235_v46 }
 0x2f5   :  { %2585 = vmatpush1.bf16.msra.mxu1 %v4236_v55 }
 0x2f6   :  { %2626 = vmatpush1.bf16.msra.mxu0 %v4237_v20  ;;  %2586 = vmatprep.subr.bf16.mxu1 %v4238_v63 }
 0x2f7   :  { %2627 = vmatprep.subr.bf16.mxu0 %v4239_v13 }
 0x2f9   :  { %2587 = vmatpush1.bf16.msra.mxu1 %v4240_v50 }
 0x2fa   :  { %2628 = vmatpush1.bf16.msra.mxu0 %v4241_v51  ;;  %2588 = vmatprep.subr.bf16.mxu1 %v4242_v9 }
 0x2fb   :  { %2629 = vmatprep.subr.bf16.mxu0 %v4243_v10 }
 0x2fd   :  { %2589 = vmatpush1.bf16.msra.mxu1 %v4244_v21 }
 0x2fe   :  { %2630 = vmatpush1.bf16.msra.mxu0 %v4245_v1  ;;  %2590 = vmatprep.subr.bf16.mxu1 %v4246_v35 }
 0x2ff   :  { %2631 = vmatprep.subr.bf16.mxu0 %v4247_v36 }
 0x301   :  { %2591 = vmatpush1.bf16.msra.mxu1 %v4248_v11 }
 0x302   :  { %2632 = vmatpush1.bf16.msra.mxu0 %v4249_v39  ;;  %2592 = vmatprep.subr.bf16.mxu1 %v4250_v40 }
 0x303   :  { %2633 = vmatprep.subr.bf16.mxu0 %v4251_v41 }
 0x305   :  { %2593 = vmatpush1.bf16.msra.mxu1 %v4252_v44 }
 0x306   :  { %2634 = vmatpush1.bf16.msra.mxu0 %v4253_v47  ;;  %2594 = vmatprep.subr.bf16.mxu1 %v4254_v48 }
 0x307   :  { %2635 = vmatprep.subr.bf16.mxu0 %v4255_v49 }
 0x309   :  { %2595 = vmatpush1.bf16.msra.mxu1 %v4256_v53 }
 0x30a   :  { %2636 = vmatpush1.bf16.msra.mxu0 %v4257_v56  ;;  %2596 = vmatprep.subr.bf16.mxu1 %v4258_v57 }
 0x30b   :  { %2637 = vmatprep.subr.bf16.mxu0 %v4259_v58 }
 0x30d   :  { %2597 = vmatpush1.bf16.msra.mxu1 %v4260_v61 }
 0x30e   :  { %2638 = vmatpush1.bf16.msra.mxu0 %v4261_v4  ;;  %2598 = vmatprep.subr.bf16.mxu1 %v4262_v6 }
 0x30f   :  { %2639 = vmatprep.subr.bf16.mxu0 %v4263_v8 }
 0x311   :  { %2599 = vmatpush1.bf16.msra.mxu1 %v3800_v25  ;;  %v3269_v25 = vmov 1966171168  }
 0x312   :  { %2640 = vmatpush1.bf16.msra.mxu0 %v3802_v0  ;;  %2600 = vmatprep.subr.bf16.mxu1 %v3806_v62  ;;  %v1591_v0 = vunpack.c.l.s4 %v3269_v25  ;;  %v1593_v62 = vlaneseq }
 0x313   :  { %2641 = vmatprep.subr.bf16.mxu0 %v4264_v15 }
 0x315   :  { %2601 = vmatpush1.bf16.msra.mxu1 %v4265_v16 }
 0x316   :  { %2642 = vmatpush1.bf16.msra.mxu0 %v3814_v5  ;;  %2602 = vmatprep.subr.bf16.mxu1 %v3818_v33  ;;  %v1592_v5 = vunpack.c.0.s8 %v1591_v0  ;;  %v1594_v33 = vshrl.u32 %v1593_v62, 7 }
 0x317   :  { %2643 = vmatprep.subr.bf16.mxu0 %v3820_v14 }
 0x318   :  { %v3988_v14 = vsub.s32 %v1592_v5, %v1594_v33 }
 0x319   :  { %2603 = vmatpush1.bf16.msra.mxu1 %v3824_v19 }
 0x31a   :  { %2644 = vmatpush1.bf16.msra.mxu0 %v3826_v27  ;;  %2604 = vmatprep.subr.bf16.mxu1 %v3830_v45 }
 0x31b   :  { %2645 = vmatprep.subr.bf16.mxu0 %v3832_v7 }
 0x31d   :  { %2605 = vmatpush1.bf16.msra.mxu1 %v3836_v34 }
 0x31e   :  { %2646 = vmatpush1.bf16.msra.mxu0 %v3838_v52 }
 0x320   :  { %2607 = vmatmul.mubr.bf16.vlgmr.msra.gmra.mrb[20].mxu1 %v3915_v12 }
 0x321   :  { %2648 = vmatmul.mubr.bf16.vlgmr.msra.gmra.mrb[20].mxu0 %v3915_v12  ;;  %v653_v12 = vld [vmem:[%s4039_s6] sm:$0x1]  ;;  %s3270_s6 = smov [#allocation6]  }
 0x322   :  { %s2796_s22 = sshll.u32 %s3270_s6, 4  ;;  %s2797_s22 = int_to_ptr.vmem [resolvable:$true] %s2796_s22 }
 0x323   :  { %s3235_s23 = scalar_lea.vmem %s2797_s22, 32  ;;  %p3240_p9 = scmp.lt.s32.totalorder %s2797_s22, %s2797_s22 }
 0x324   :  { %p3236_p8 = scmp.ne.s32.totalorder %s2797_s22, %s3235_s23  ;;  %p3241_p10 = scmp.lt.s32.totalorder %s3235_s23, %s3235_s23 }
 0x326   :  { %p3242_p11 = por %p3241_p10, %p3240_p9 }
 0x328   :  { %p3243_p12 = pnand %p3242_p11, %p3236_p8 }
 0x333   :  { %v1458_v19 = vpop.f32.mrb[8].mxu1  ;;  %v1499_v27 = vpop.f32.mrb[8].mxu0 }
 0x334   :  { %v1614_v45 = vrot.slane %v1499_v27, %v3988_v14  ;;  %v1460_v7 = vpop.f32.mrb[9].mxu1  ;;  %v1501_v17 = vpop.f32.mrb[9].mxu0  ;;  %v1588_v32 = vadd.f32 %v1458_v19, %v653_v12 }
 0x335   :  { %v1596_v34 = vrot.slane %v1460_v7, %v3988_v14  ;;  %v1632_v52 = vrot.slane %v1501_v17, %v3988_v14  ;;  %v1462_v2 = vpop.f32.mrb[10].mxu1  ;;  %v1503_v22 = vpop.f32.mrb[10].mxu0 }
 0x336   :  { %v1463_v23 = vpop.f32.mrb[11].mxu1  ;;  %v1504_v24 = vpop.f32.mrb[11].mxu0  ;;  %v1621_v26 = vrot.slane %v1614_v45, %v3988_v14 }
 0x337   :  { %v1597_v30 = vcombine.high %v1596_v34, %v1596_v34  ;;  %v1633_v31 = vcombine.high %v1632_v52, %v1632_v52 }
 0x338   :  { %v1622_v43 = vcombine.high %v1621_v26, %v1621_v26 }
 0x339   :  { %v1604_v38 = vrot.slane %v1597_v30, %v3988_v14  ;;  %v1640_v42 = vrot.slane %v1633_v31, %v3988_v14 }
 0x33b   :  { %v1606_v59 = vadd.f32 %v1604_v38, %v1588_v32  ;;  %v1641_v18 = vcombine.high %v1640_v42, %v1640_v42 }
 0x33d   :  { %v1624_v60 = vadd.f32 %v1622_v43, %v1606_v59 }
 0x33f   :  { %v1643_v29 = vadd.f32 %v1641_v18, %v1624_v60 }
 0x373   :  { %v1540_v54 = vpop.f32.mrb[12].mxu1  ;;  %v1581_v37 = vpop.f32.mrb[12].mxu0 }
 0x374   :  { %v1645_v28 = vcombine.high %v1540_v54, %v1540_v54  ;;  %v1682_v3 = vcombine.high %v1581_v37, %v1581_v37  ;;  %v1542_v46 = vpop.f32.mrb[13].mxu1  ;;  %v1583_v55 = vpop.f32.mrb[13].mxu0 }
 0x375   :  { %v1663_v20 = vcombine.high %v1542_v46, %v1542_v46  ;;  %v1701_v63 = vcombine.high %v1583_v55, %v1583_v55  ;;  %v1544_v13 = vpop.f32.mrb[14].mxu1  ;;  %v1585_v50 = vpop.f32.mrb[14].mxu0 }
 0x376   :  { %v1652_v51 = vrot.slane %v1645_v28, %v3988_v14  ;;  %v1689_v9 = vrot.slane %v1682_v3, %v3988_v14  ;;  %v1545_v10 = vpop.f32.mrb[15].mxu1  ;;  %v1586_v21 = vpop.f32.mrb[15].mxu0 }
 0x377   :  { %v1670_v1 = vrot.slane %v1663_v20, %v3988_v14  ;;  %v1708_v35 = vrot.slane %v1701_v63, %v3988_v14 }
 0x378   :  { %v1659_v36 = vrot.slane %v1652_v51, %v3988_v14  ;;  %v1696_v11 = vrot.slane %v1689_v9, %v3988_v14 }
 0x379   :  { %v1671_v39 = vcombine.high %v1670_v1, %v1670_v1  ;;  %v1709_v40 = vcombine.high %v1708_v35, %v1708_v35 }
 0x37a   :  { %v1661_v41 = vadd.f32 %v1659_v36, %v1643_v29  ;;  %v1697_v48 = vcombine.high %v1696_v11, %v1696_v11 }
 0x37b   :  { %v1678_v44 = vrot.slane %v1671_v39, %v3988_v14  ;;  %v1716_v47 = vrot.slane %v1709_v40, %v3988_v14 }
 0x37d   :  { %v1680_v49 = vadd.f32 %v1678_v44, %v1661_v41  ;;  %v1717_v53 = vcombine.high %v1716_v47, %v1716_v47 }
 0x37f   :  { %v1699_v56 = vadd.f32 %v1697_v48, %v1680_v49 }
 0x381   :  { %v1719_v57 = vadd.f32 %v1717_v53, %v1699_v56 }
 0x383   :  { %v1720_v58 = vmax.f32 %v1719_v57, 0.0 }
 0x385   :  { %1721 = vst [vmem:[#allocation6] sm:$0x1] %v1720_v58 }
 0x3b3   :  { %v2526_v61 = vpop.f32.mrb[16].mxu1 }
 0x3b4   :  { %v2567_v4 = vpop.f32.mrb[16].mxu0  ;;  %v2528_v6 = vpop.f32.mrb[17].mxu1  ;;  %v2656_v7 = vadd.f32 %v2526_v61, %v653_v12 }
 0x3b5   :  { %v2682_v8 = vrot.slane %v2567_v4, %v3988_v14  ;;  %v2664_v15 = vrot.slane %v2528_v6, %v3988_v14  ;;  %v2569_v16 = vpop.f32.mrb[17].mxu0  ;;  %v2530_v25 = vpop.f32.mrb[18].mxu1 }
 0x3b6   :  { %v2700_v0 = vrot.slane %v2569_v16, %v3988_v14  ;;  %v2571_v62 = vpop.f32.mrb[18].mxu0  ;;  %v2531_v5 = vpop.f32.mrb[19].mxu1 }
 0x3b7   :  { %v2689_v33 = vrot.slane %v2682_v8, %v3988_v14  ;;  %v2665_v19 = vcombine.high %v2664_v15, %v2664_v15  ;;  %v2572_v27 = vpop.f32.mrb[19].mxu0 }
 0x3b8   :  { %v2701_v45 = vcombine.high %v2700_v0, %v2700_v0 }
 0x3b9   :  { %v2672_v17 = vrot.slane %v2665_v19, %v3988_v14  ;;  %v2690_v52 = vcombine.high %v2689_v33, %v2689_v33 }
 0x3ba   :  { %v2708_v34 = vrot.slane %v2701_v45, %v3988_v14 }
 0x3bb   :  { %v2674_v2 = vadd.f32 %v2672_v17, %v2656_v7 }
 0x3bc   :  { %v2709_v23 = vcombine.high %v2708_v34, %v2708_v34 }
 0x3bd   :  { %v2692_v22 = vadd.f32 %v2690_v52, %v2674_v2 }
 0x3bf   :  { %v2711_v24 = vadd.f32 %v2709_v23, %v2692_v22 }
 0x3f3   :  { %v2608_v26 = vpop.f32.mrb[20].mxu1 }
 0x3f4   :  { %v2713_v30 = vcombine.high %v2608_v26, %v2608_v26  ;;  %v2649_v31 = vpop.f32.mrb[20].mxu0  ;;  %v2610_v32 = vpop.f32.mrb[21].mxu1 }
 0x3f5   :  { %v2750_v38 = vcombine.high %v2649_v31, %v2649_v31  ;;  %v2731_v42 = vcombine.high %v2610_v32, %v2610_v32  ;;  %v2651_v43 = vpop.f32.mrb[21].mxu0  ;;  %v2612_v59 = vpop.f32.mrb[22].mxu1 }
 0x3f6   :  { %v2720_v60 = vrot.slane %v2713_v30, %v3988_v14  ;;  %v2769_v12 = vcombine.high %v2651_v43, %v2651_v43  ;;  %v2653_v18 = vpop.f32.mrb[22].mxu0  ;;  %v2613_v29 = vpop.f32.mrb[23].mxu1 }
 0x3f7   :  { %v2757_v54 = vrot.slane %v2750_v38, %v3988_v14  ;;  %v2738_v37 = vrot.slane %v2731_v42, %v3988_v14  ;;  %v2654_v28 = vpop.f32.mrb[23].mxu0 }
 0x3f8   :  { %v2727_v3 = vrot.slane %v2720_v60, %v3988_v14  ;;  %v2776_v46 = vrot.slane %v2769_v12, %v3988_v14 }
 0x3f9   :  { %v2764_v55 = vrot.slane %v2757_v54, %v3988_v14  ;;  %v2739_v20 = vcombine.high %v2738_v37, %v2738_v37 }
 0x3fa   :  { %v2729_v63 = vadd.f32 %v2727_v3, %v2711_v24  ;;  %v2777_v13 = vcombine.high %v2776_v46, %v2776_v46 }
 0x3fb   :  { %v2746_v50 = vrot.slane %v2739_v20, %v3988_v14  ;;  %v2765_v9 = vcombine.high %v2764_v55, %v2764_v55 }
 0x3fc   :  { %v2784_v51 = vrot.slane %v2777_v13, %v3988_v14 }
 0x3fd   :  { %v2748_v10 = vadd.f32 %v2746_v50, %v2729_v63 }
 0x3fe   :  { %v2785_v21 = vcombine.high %v2784_v51, %v2784_v51 }
 0x3ff   :  { %v2767_v1 = vadd.f32 %v2765_v9, %v2748_v10 }
 0x401   :  { %v2787_v35 = vadd.f32 %v2785_v21, %v2767_v1 }
 0x403   :  { %v2788_v36 = vmax.f32 %v2787_v35, 0.0 }
 0x405   :  { %2789 = vst [vmem:[#allocation6 + $0x1] sm:$0x1] %v2788_v36 }
 0x406   :  { %3246 = shalt.err (!%p3243_p12)
}
 0x407   :  { %s3247_s26 = scalar_lea.hbm %s4040_s7, 32 }
 0x408   :  { %p3248_p13 = scmp.ne.s32.totalorder %s4040_s7, %s3247_s26  ;;  %p3251_p0 = scmp.lt.u32.totalorder %s3247_s26, %s4040_s7 }
 0x40a   :  { %p3253_p1 = pnand %p3251_p0, %p3248_p13 }
 0x40c   :  { %3256 = shalt.err (!%p3253_p1)
}
 0x40d   :  { %2799 = dma.vmem_to_hbm [thread:$0]  %s2797_s22, 32, %s4040_s7, [#allocation5]  }
 0x40e   :  { %3259 = dma.done.wait [#allocation5], 32  }
 0x40f   :  { %3260 = vsyncadd [#allocation5], 4294967264 }
 0x410   :  { %2803 = vsyncpa [#allocation4], 1 }
 0x411   :  { %2804 = vsyncpa [#allocation5], 1 }

</bundles_post_ra>
